<compile_context>
chip_gen: v6e
topology: v6e:2x2x1
jax: 0.10.0
libtpu: 0.0.40
codegen_flags: <defaults>
</compile_context>

<pallas_src>
import functools

import jax
import jax.numpy as jnp
from jax.experimental import pallas as pl
from jax.experimental.pallas import tpu as pltpu

D_MODEL = 32
N_HEADS = 4
HEAD_DIM = D_MODEL // N_HEADS
D_FF = 64
N_LAYERS = 2
LN_EPS = 1e-5

# Packed per-layer vector slab layout: (N_LAYERS, _N_VEC_ROWS, _VEC_W)
_VEC_W = max(3 * D_MODEL, D_FF)          # 96
_ROW_BQKV, _ROW_BO, _ROW_LN1G, _ROW_LN1B = 0, 1, 2, 3
_ROW_B1, _ROW_B2, _ROW_LN2G, _ROW_LN2B = 4, 5, 6, 7
_N_VEC_ROWS = 8


def _layernorm(x, gamma, beta):
    # x: (N, D); gamma/beta: (1, D) -- biased variance, matching nn.LayerNorm.
    mu = jnp.mean(x, axis=-1, keepdims=True)
    var = jnp.mean((x - mu) ** 2, axis=-1, keepdims=True)
    return (x - mu) * jax.lax.rsqrt(var + LN_EPS) * gamma + beta


def _make_encoder_kernel(B, S):
    D, F, H, HD, L = D_MODEL, D_FF, N_HEADS, HEAD_DIM, N_LAYERS
    BS = B * S

    def kernel(x_ref, wqkv_ref, wo_ref, w1_ref, w2_ref, vecs_ref, nrm_ref, out_ref):
        x = x_ref[...]                                     # (B*S, D) float32

        for l in range(L):                                 # static unroll over layers
            vec = vecs_ref[l]                              # (8, 96) packed vectors (f32)
            bqkv = vec[_ROW_BQKV:_ROW_BQKV + 1, :3 * D]    # (1, 3D)
            bo = vec[_ROW_BO:_ROW_BO + 1, :D]
            g1 = vec[_ROW_LN1G:_ROW_LN1G + 1, :D]
            b1n = vec[_ROW_LN1B:_ROW_LN1B + 1, :D]
            b1 = vec[_ROW_B1:_ROW_B1 + 1, :F]
            b2 = vec[_ROW_B2:_ROW_B2 + 1, :D]
            g2 = vec[_ROW_LN2G:_ROW_LN2G + 1, :D]
            b2n = vec[_ROW_LN2B:_ROW_LN2B + 1, :D]

            # ---- fused Q/K/V projection (bf16 MXU operands, f32 accumulate) ---
            qkv = jnp.dot(x.astype(jnp.bfloat16), wqkv_ref[l],
                          preferred_element_type=jnp.float32) + bqkv   # (B*S, 3D) f32

            # ---- multi-head self-attention (mask=None) -------------------------
            # Heads stacked on the leading (major) axis -> one batched contraction
            # over all B*H pairs, one softmax, one batched context contraction.
            # TODO(synk): additive attn_mask / key-padding-mask support (forward is
            # exercised with mask=None).
            def head_stack(base):
                return jnp.concatenate(
                    [qkv[:, base + h * HD: base + (h + 1) * HD].reshape(B, S, HD)
                     for h in range(H)], axis=0).astype(jnp.bfloat16)   # (H*B, S, HD)

            q_bh = head_stack(0)          # 1/sqrt(HD) already folded into Wq at init
            k_bh = head_stack(D)
            v_bh = head_stack(2 * D)

            s = jnp.einsum('bqd,bkd->bqk', q_bh, k_bh,
                           preferred_element_type=jnp.float32)          # (H*B, S, S) f32
            s = s - jnp.max(s, axis=-1, keepdims=True)
            p = jnp.exp(s)
            p = p * pl.reciprocal(jnp.sum(p, axis=-1, keepdims=True), approx=True)
            ctx_bh = jnp.einsum('bqk,bkd->bqd', p.astype(jnp.bfloat16), v_bh,
                                preferred_element_type=jnp.float32)     # (H*B, S, HD) f32

            # heads back onto the feature (lane) axis in PyTorch MHA order.
            ctx = jnp.concatenate(
                [ctx_bh[h * B:(h + 1) * B].reshape(BS, HD) for h in range(H)],
                axis=-1)                                                # (B*S, D) f32

            attn = jnp.dot(ctx.astype(jnp.bfloat16), wo_ref[l],
                           preferred_element_type=jnp.float32) + bo

            # ---- residual + LayerNorm 1 (f32) ----------------------------------
            x = _layernorm(x + attn, g1, b1n)

            # ---- ReLU feed-forward + residual + LayerNorm 2 ---------------------
            h1 = jnp.maximum(
                jnp.dot(x.astype(jnp.bfloat16), w1_ref[l],
                        preferred_element_type=jnp.float32) + b1, 0.0)
            ff = jnp.dot(h1.astype(jnp.bfloat16), w2_ref[l],
                         preferred_element_type=jnp.float32) + b2
            x = _layernorm(x + ff, g2, b2n)

        # ---- final encoder LayerNorm (norm_layer) --------------------------------
        out_ref[...] = _layernorm(x, nrm_ref[0:1, :], nrm_ref[1:2, :])

    return kernel


@functools.lru_cache(maxsize=None)
def _build_encoder_call(B, S):
    # Grid-less pallas_call: the activation slab + ~30 KB of stacked bf16/f32
    # weights are DMA'd whole into VMEM once and the entire encoder runs in one
    # launch.  Explicit VMEM BlockSpecs document the residency contract.
    n_in = 7
    return pl.pallas_call(
        _make_encoder_kernel(B, S),
        out_shape=jax.ShapeDtypeStruct((B * S, D_MODEL), jnp.float32),
        in_specs=[pl.BlockSpec(memory_space=pltpu.MemorySpace.VMEM)
                  for _ in range(n_in)],
        out_specs=pl.BlockSpec(memory_space=pltpu.MemorySpace.VMEM),
    )


@jax.jit
def _encoder_forward_impl(x, params):
    B, S, D = x.shape
    call = _build_encoder_call(B, S)
    # Fold (B, S) into one row axis so any batch size amortizes the single launch.
    y = call(x.reshape(B * S, D),
             params["wqkv"], params["wo"], params["w1"], params["w2"],
             params["vecs"], params["norm"])
    return y.reshape(B, S, D)


def encoder_forward(x, params, mask=None, src_key_padding_mask=None):
    # Mirrors Encoder.forward with conv_layers=None and norm_layer=LayerNorm.
    # TODO(synk): conv_layers branch and attn_mask/src_key_padding_mask paths
    # are not instantiated here (Encoder is exercised with mask=None).
    assert mask is None and src_key_padding_mask is None
    return _encoder_forward_impl(x, params)


def init_params(key):
    L, D, F, HD = N_LAYERS, D_MODEL, D_FF, HEAD_DIM
    keys = jax.random.split(key, 6)
    s = 0.05
    q_scale = 1.0 / (HD ** 0.5)

    # Fold the attention 1/sqrt(head_dim) scale into the Q projection columns.
    wqkv = s * jax.random.normal(keys[0], (L, D, 3 * D), jnp.float32)
    wqkv = wqkv.at[:, :, :D].multiply(q_scale)

    params = {
        # bf16 MXU operands (weights pre-transposed to (in_features, out_features)).
        "wqkv": wqkv.astype(jnp.bfloat16),
        "wo":   (s * jax.random.normal(keys[1], (L, D, D), jnp.float32)).astype(jnp.bfloat16),
        "w1":   (s * jax.random.normal(keys[2], (L, D, F), jnp.float32)).astype(jnp.bfloat16),
        "w2":   (s * jax.random.normal(keys[3], (L, F, D), jnp.float32)).astype(jnp.bfloat16),
    }
    # Packed per-layer vectors (f32): qkv bias / out bias / ln1 g,b / ffn biases / ln2 g,b.
    vecs = jnp.zeros((L, _N_VEC_ROWS, _VEC_W), jnp.float32)
    vecs = vecs.at[:, _ROW_LN1G, :D].set(1.0)   # ln1 gamma
    vecs = vecs.at[:, _ROW_LN2G, :D].set(1.0)   # ln2 gamma
    vecs = vecs.at[:, _ROW_B1, :F].set(
        0.01 * jax.random.normal(keys[4], (L, F), jnp.float32))
    vecs = vecs.at[:, _ROW_B2, :D].set(
        0.01 * jax.random.normal(keys[5], (L, D), jnp.float32))
    # The q-part of the qkv bias must carry the same folded scale (zero here).
    vecs = vecs.at[:, _ROW_BQKV, :D].multiply(q_scale)
    params["vecs"] = vecs
    # Final LayerNorm: row 0 = gamma, row 1 = beta.
    params["norm"] = jnp.concatenate(
        [jnp.ones((1, D), jnp.float32), jnp.zeros((1, D), jnp.float32)], axis=0)
    return params


if __name__ == "__main__":
    key = jax.random.PRNGKey(0)
    kx, kp = jax.random.split(key)
    B, S = 2, 8
    x = jax.random.normal(kx, (B, S, D_MODEL), jnp.float32)
    params = init_params(kp)

    y = encoder_forward(x, params, mask=None)
    jax.block_until_ready(y)
    assert y.shape == (B, S, D_MODEL)
    assert bool(jnp.all(jnp.isfinite(y)))
    print("KERNEL_OK")
</pallas_src>

<mosaic_0001>
module attributes {stable_mosaic.version = 11 : i64} {
  func.func @kernel(%arg0: memref<16x32xf32, #tpu.memory_space<vmem>>, %arg1: memref<2x32x96xbf16, #tpu.memory_space<vmem>>, %arg2: memref<2x32x32xbf16, #tpu.memory_space<vmem>>, %arg3: memref<2x32x64xbf16, #tpu.memory_space<vmem>>, %arg4: memref<2x64x32xbf16, #tpu.memory_space<vmem>>, %arg5: memref<2x8x96xf32, #tpu.memory_space<vmem>>, %arg6: memref<2x32xf32, #tpu.memory_space<vmem>>, %arg7: memref<16x32xf32, #tpu.memory_space<vmem>>) attributes {dimension_semantics = [], scalar_prefetch = 0 : i64, scratch_operands = 0 : i64, tpu.core_type = #tpu.core_type<tc>} {
    %c0 = arith.constant 0 : index
    %c0_0 = arith.constant 0 : index
    %0 = vector.load %arg0[%c0, %c0_0] : memref<16x32xf32, #tpu.memory_space<vmem>>, vector<16x32xf32>
    %c0_1 = arith.constant 0 : index
    %c0_2 = arith.constant 0 : index
    %c0_3 = arith.constant 0 : index
    %1 = vector.load %arg5[%c0_1, %c0_2, %c0_3] : memref<2x8x96xf32, #tpu.memory_space<vmem>>, vector<1x8x96xf32>
    %2 = vector.shape_cast %1 : vector<1x8x96xf32> to vector<8x96xf32>
    %3 = vector.extract_strided_slice %2 {offsets = [0, 0], sizes = [1, 96], strides = [1, 1]} : vector<8x96xf32> to vector<1x96xf32>
    %4 = vector.extract_strided_slice %2 {offsets = [1, 0], sizes = [1, 32], strides = [1, 1]} : vector<8x96xf32> to vector<1x32xf32>
    %5 = vector.extract_strided_slice %2 {offsets = [2, 0], sizes = [1, 32], strides = [1, 1]} : vector<8x96xf32> to vector<1x32xf32>
    %6 = vector.extract_strided_slice %2 {offsets = [3, 0], sizes = [1, 32], strides = [1, 1]} : vector<8x96xf32> to vector<1x32xf32>
    %7 = vector.extract_strided_slice %2 {offsets = [4, 0], sizes = [1, 64], strides = [1, 1]} : vector<8x96xf32> to vector<1x64xf32>
    %8 = vector.extract_strided_slice %2 {offsets = [5, 0], sizes = [1, 32], strides = [1, 1]} : vector<8x96xf32> to vector<1x32xf32>
    %9 = vector.extract_strided_slice %2 {offsets = [6, 0], sizes = [1, 32], strides = [1, 1]} : vector<8x96xf32> to vector<1x32xf32>
    %10 = vector.extract_strided_slice %2 {offsets = [7, 0], sizes = [1, 32], strides = [1, 1]} : vector<8x96xf32> to vector<1x32xf32>
    %11 = arith.truncf %0 : vector<16x32xf32> to vector<16x32xbf16>
    %c0_4 = arith.constant 0 : index
    %c0_5 = arith.constant 0 : index
    %c0_6 = arith.constant 0 : index
    %12 = vector.load %arg1[%c0_4, %c0_5, %c0_6] : memref<2x32x96xbf16, #tpu.memory_space<vmem>>, vector<1x32x96xbf16>
    %13 = vector.shape_cast %12 : vector<1x32x96xbf16> to vector<32x96xbf16>
    %cst = arith.constant dense<0.000000e+00> : vector<16x96xf32>
    %14 = tpu.matmul %11, %13, %cst {dimension_numbers = #tpu.dot_dimension_numbers<[1], [0], [0], [1], [0, 0, 1, 1], [], []>} : vector<16x32xbf16>, vector<32x96xbf16>, vector<16x96xf32> -> vector<16x96xf32>
    %15 = vector.broadcast %3 : vector<1x96xf32> to vector<16x96xf32>
    %16 = arith.addf %14, %15 : vector<16x96xf32>
    %17 = vector.extract_strided_slice %16 {offsets = [0, 0], sizes = [16, 8], strides = [1, 1]} : vector<16x96xf32> to vector<16x8xf32>
    %18 = vector.shape_cast %17 : vector<16x8xf32> to vector<2x8x8xf32>
    %19 = vector.extract_strided_slice %16 {offsets = [0, 8], sizes = [16, 8], strides = [1, 1]} : vector<16x96xf32> to vector<16x8xf32>
    %20 = vector.shape_cast %19 : vector<16x8xf32> to vector<2x8x8xf32>
    %21 = vector.extract_strided_slice %16 {offsets = [0, 16], sizes = [16, 8], strides = [1, 1]} : vector<16x96xf32> to vector<16x8xf32>
    %22 = vector.shape_cast %21 : vector<16x8xf32> to vector<2x8x8xf32>
    %23 = vector.extract_strided_slice %16 {offsets = [0, 24], sizes = [16, 8], strides = [1, 1]} : vector<16x96xf32> to vector<16x8xf32>
    %24 = vector.shape_cast %23 : vector<16x8xf32> to vector<2x8x8xf32>
    %25 = tpu.concatenate %18, %20, %22, %24 in 0 : vector<2x8x8xf32>, vector<2x8x8xf32>, vector<2x8x8xf32>, vector<2x8x8xf32> -> vector<8x8x8xf32>
    %26 = arith.truncf %25 : vector<8x8x8xf32> to vector<8x8x8xbf16>
    %27 = vector.extract_strided_slice %16 {offsets = [0, 32], sizes = [16, 8], strides = [1, 1]} : vector<16x96xf32> to vector<16x8xf32>
    %28 = vector.shape_cast %27 : vector<16x8xf32> to vector<2x8x8xf32>
    %29 = vector.extract_strided_slice %16 {offsets = [0, 40], sizes = [16, 8], strides = [1, 1]} : vector<16x96xf32> to vector<16x8xf32>
    %30 = vector.shape_cast %29 : vector<16x8xf32> to vector<2x8x8xf32>
    %31 = vector.extract_strided_slice %16 {offsets = [0, 48], sizes = [16, 8], strides = [1, 1]} : vector<16x96xf32> to vector<16x8xf32>
    %32 = vector.shape_cast %31 : vector<16x8xf32> to vector<2x8x8xf32>
    %33 = vector.extract_strided_slice %16 {offsets = [0, 56], sizes = [16, 8], strides = [1, 1]} : vector<16x96xf32> to vector<16x8xf32>
    %34 = vector.shape_cast %33 : vector<16x8xf32> to vector<2x8x8xf32>
    %35 = tpu.concatenate %28, %30, %32, %34 in 0 : vector<2x8x8xf32>, vector<2x8x8xf32>, vector<2x8x8xf32>, vector<2x8x8xf32> -> vector<8x8x8xf32>
    %36 = arith.truncf %35 : vector<8x8x8xf32> to vector<8x8x8xbf16>
    %37 = vector.extract_strided_slice %16 {offsets = [0, 64], sizes = [16, 8], strides = [1, 1]} : vector<16x96xf32> to vector<16x8xf32>
    %38 = vector.shape_cast %37 : vector<16x8xf32> to vector<2x8x8xf32>
    %39 = vector.extract_strided_slice %16 {offsets = [0, 72], sizes = [16, 8], strides = [1, 1]} : vector<16x96xf32> to vector<16x8xf32>
    %40 = vector.shape_cast %39 : vector<16x8xf32> to vector<2x8x8xf32>
    %41 = vector.extract_strided_slice %16 {offsets = [0, 80], sizes = [16, 8], strides = [1, 1]} : vector<16x96xf32> to vector<16x8xf32>
    %42 = vector.shape_cast %41 : vector<16x8xf32> to vector<2x8x8xf32>
    %43 = vector.extract_strided_slice %16 {offsets = [0, 88], sizes = [16, 8], strides = [1, 1]} : vector<16x96xf32> to vector<16x8xf32>
    %44 = vector.shape_cast %43 : vector<16x8xf32> to vector<2x8x8xf32>
    %45 = tpu.concatenate %38, %40, %42, %44 in 0 : vector<2x8x8xf32>, vector<2x8x8xf32>, vector<2x8x8xf32>, vector<2x8x8xf32> -> vector<8x8x8xf32>
    %46 = arith.truncf %45 : vector<8x8x8xf32> to vector<8x8x8xbf16>
    "tpu.trace_start"() <{level = 10 : i32, message = "bqd,bkd->bqk"}> : () -> ()
    %cst_7 = arith.constant dense<0.000000e+00> : vector<8x8x8xf32>
    %47 = tpu.matmul %26, %36, %cst_7 {dimension_numbers = #tpu.dot_dimension_numbers<[2], [2], [1], [1], [0, 0, 0, 1, 1, 1], [0], [0]>} : vector<8x8x8xbf16>, vector<8x8x8xbf16>, vector<8x8x8xf32> -> vector<8x8x8xf32>
    "tpu.trace_stop"() : () -> ()
    %cst_8 = arith.constant dense<0xFF800000> : vector<8x8xf32>
    %48 = vector.multi_reduction <maximumf>, %47, %cst_8 [2] : vector<8x8x8xf32> to vector<8x8xf32>
    %49 = vector.shape_cast %48 : vector<8x8xf32> to vector<8x8x1xf32>
    %50 = vector.broadcast %49 : vector<8x8x1xf32> to vector<8x8x8xf32>
    %51 = arith.subf %47, %50 : vector<8x8x8xf32>
    %52 = math.exp %51 : vector<8x8x8xf32>
    %cst_9 = arith.constant dense<0.000000e+00> : vector<8x8xf32>
    %53 = vector.multi_reduction <add>, %52, %cst_9 [2] : vector<8x8x8xf32> to vector<8x8xf32>
    %54 = vector.shape_cast %53 : vector<8x8xf32> to vector<8x8x1xf32>
    %55 = tpu.reciprocal %54 {approx = true} : vector<8x8x1xf32> -> vector<8x8x1xf32>
    %56 = vector.broadcast %55 : vector<8x8x1xf32> to vector<8x8x8xf32>
    %57 = arith.mulf %52, %56 : vector<8x8x8xf32>
    %58 = arith.truncf %57 : vector<8x8x8xf32> to vector<8x8x8xbf16>
    "tpu.trace_start"() <{level = 10 : i32, message = "bqk,bkd->bqd"}> : () -> ()
    %cst_10 = arith.constant dense<0.000000e+00> : vector<8x8x8xf32>
    %59 = tpu.matmul %58, %46, %cst_10 {dimension_numbers = #tpu.dot_dimension_numbers<[2], [1], [1], [2], [0, 0, 0, 1, 1, 2], [0], [0]>} : vector<8x8x8xbf16>, vector<8x8x8xbf16>, vector<8x8x8xf32> -> vector<8x8x8xf32>
    "tpu.trace_stop"() : () -> ()
    %60 = vector.extract_strided_slice %59 {offsets = [0, 0, 0], sizes = [2, 8, 8], strides = [1, 1, 1]} : vector<8x8x8xf32> to vector<2x8x8xf32>
    %61 = vector.shape_cast %60 : vector<2x8x8xf32> to vector<16x8xf32>
    %62 = vector.extract_strided_slice %59 {offsets = [2, 0, 0], sizes = [2, 8, 8], strides = [1, 1, 1]} : vector<8x8x8xf32> to vector<2x8x8xf32>
    %63 = vector.shape_cast %62 : vector<2x8x8xf32> to vector<16x8xf32>
    %64 = vector.extract_strided_slice %59 {offsets = [4, 0, 0], sizes = [2, 8, 8], strides = [1, 1, 1]} : vector<8x8x8xf32> to vector<2x8x8xf32>
    %65 = vector.shape_cast %64 : vector<2x8x8xf32> to vector<16x8xf32>
    %66 = vector.extract_strided_slice %59 {offsets = [6, 0, 0], sizes = [2, 8, 8], strides = [1, 1, 1]} : vector<8x8x8xf32> to vector<2x8x8xf32>
    %67 = vector.shape_cast %66 : vector<2x8x8xf32> to vector<16x8xf32>
    %68 = tpu.concatenate %61, %63, %65, %67 in 1 : vector<16x8xf32>, vector<16x8xf32>, vector<16x8xf32>, vector<16x8xf32> -> vector<16x32xf32>
    %69 = arith.truncf %68 : vector<16x32xf32> to vector<16x32xbf16>
    %c0_11 = arith.constant 0 : index
    %c0_12 = arith.constant 0 : index
    %c0_13 = arith.constant 0 : index
    %70 = vector.load %arg2[%c0_11, %c0_12, %c0_13] : memref<2x32x32xbf16, #tpu.memory_space<vmem>>, vector<1x32x32xbf16>
    %71 = vector.shape_cast %70 : vector<1x32x32xbf16> to vector<32x32xbf16>
    %cst_14 = arith.constant dense<0.000000e+00> : vector<16x32xf32>
    %72 = tpu.matmul %69, %71, %cst_14 {dimension_numbers = #tpu.dot_dimension_numbers<[1], [0], [0], [1], [0, 0, 1, 1], [], []>} : vector<16x32xbf16>, vector<32x32xbf16>, vector<16x32xf32> -> vector<16x32xf32>
    %73 = vector.broadcast %4 : vector<1x32xf32> to vector<16x32xf32>
    %74 = arith.addf %72, %73 : vector<16x32xf32>
    %75 = arith.addf %0, %74 : vector<16x32xf32>
    %cst_15 = arith.constant dense<0.000000e+00> : vector<16xf32>
    %76 = vector.multi_reduction <add>, %75, %cst_15 [1] : vector<16x32xf32> to vector<16xf32>
    %77 = vector.shape_cast %76 : vector<16xf32> to vector<16x1xf32>
    %cst_16 = arith.constant 3.200000e+01 : f32
    %78 = vector.broadcast %cst_16 : f32 to vector<16x1xf32>
    %79 = arith.divf %77, %78 : vector<16x1xf32>
    %80 = vector.broadcast %79 : vector<16x1xf32> to vector<16x32xf32>
    %81 = arith.subf %75, %80 : vector<16x32xf32>
    %82 = arith.mulf %81, %81 : vector<16x32xf32>
    %cst_17 = arith.constant dense<0.000000e+00> : vector<16xf32>
    %83 = vector.multi_reduction <add>, %82, %cst_17 [1] : vector<16x32xf32> to vector<16xf32>
    %84 = vector.shape_cast %83 : vector<16xf32> to vector<16x1xf32>
    %cst_18 = arith.constant 3.200000e+01 : f32
    %85 = vector.broadcast %cst_18 : f32 to vector<16x1xf32>
    %86 = arith.divf %84, %85 : vector<16x1xf32>
    %87 = vector.broadcast %79 : vector<16x1xf32> to vector<16x32xf32>
    %88 = arith.subf %75, %87 : vector<16x32xf32>
    %cst_19 = arith.constant 9.99999974E-6 : f32
    %89 = vector.broadcast %cst_19 : f32 to vector<16x1xf32>
    %90 = arith.addf %86, %89 : vector<16x1xf32>
    %91 = math.rsqrt %90 : vector<16x1xf32>
    %92 = vector.broadcast %91 : vector<16x1xf32> to vector<16x32xf32>
    %93 = arith.mulf %88, %92 : vector<16x32xf32>
    %94 = vector.broadcast %5 : vector<1x32xf32> to vector<16x32xf32>
    %95 = arith.mulf %93, %94 : vector<16x32xf32>
    %96 = vector.broadcast %6 : vector<1x32xf32> to vector<16x32xf32>
    %97 = arith.addf %95, %96 : vector<16x32xf32>
    %98 = arith.truncf %97 : vector<16x32xf32> to vector<16x32xbf16>
    %c0_20 = arith.constant 0 : index
    %c0_21 = arith.constant 0 : index
    %c0_22 = arith.constant 0 : index
    %99 = vector.load %arg3[%c0_20, %c0_21, %c0_22] : memref<2x32x64xbf16, #tpu.memory_space<vmem>>, vector<1x32x64xbf16>
    %100 = vector.shape_cast %99 : vector<1x32x64xbf16> to vector<32x64xbf16>
    %cst_23 = arith.constant dense<0.000000e+00> : vector<16x64xf32>
    %101 = tpu.matmul %98, %100, %cst_23 {dimension_numbers = #tpu.dot_dimension_numbers<[1], [0], [0], [1], [0, 0, 1, 1], [], []>} : vector<16x32xbf16>, vector<32x64xbf16>, vector<16x64xf32> -> vector<16x64xf32>
    %102 = vector.broadcast %7 : vector<1x64xf32> to vector<16x64xf32>
    %103 = arith.addf %101, %102 : vector<16x64xf32>
    %cst_24 = arith.constant 0.000000e+00 : f32
    %104 = vector.broadcast %cst_24 : f32 to vector<16x64xf32>
    %105 = arith.maximumf %103, %104 : vector<16x64xf32>
    %106 = arith.truncf %105 : vector<16x64xf32> to vector<16x64xbf16>
    %c0_25 = arith.constant 0 : index
    %c0_26 = arith.constant 0 : index
    %c0_27 = arith.constant 0 : index
    %107 = vector.load %arg4[%c0_25, %c0_26, %c0_27] : memref<2x64x32xbf16, #tpu.memory_space<vmem>>, vector<1x64x32xbf16>
    %108 = vector.shape_cast %107 : vector<1x64x32xbf16> to vector<64x32xbf16>
    %cst_28 = arith.constant dense<0.000000e+00> : vector<16x32xf32>
    %109 = tpu.matmul %106, %108, %cst_28 {dimension_numbers = #tpu.dot_dimension_numbers<[1], [0], [0], [1], [0, 0, 1, 1], [], []>} : vector<16x64xbf16>, vector<64x32xbf16>, vector<16x32xf32> -> vector<16x32xf32>
    %110 = vector.broadcast %8 : vector<1x32xf32> to vector<16x32xf32>
    %111 = arith.addf %109, %110 : vector<16x32xf32>
    %112 = arith.addf %97, %111 : vector<16x32xf32>
    %cst_29 = arith.constant dense<0.000000e+00> : vector<16xf32>
    %113 = vector.multi_reduction <add>, %112, %cst_29 [1] : vector<16x32xf32> to vector<16xf32>
    %114 = vector.shape_cast %113 : vector<16xf32> to vector<16x1xf32>
    %cst_30 = arith.constant 3.200000e+01 : f32
    %115 = vector.broadcast %cst_30 : f32 to vector<16x1xf32>
    %116 = arith.divf %114, %115 : vector<16x1xf32>
    %117 = vector.broadcast %116 : vector<16x1xf32> to vector<16x32xf32>
    %118 = arith.subf %112, %117 : vector<16x32xf32>
    %119 = arith.mulf %118, %118 : vector<16x32xf32>
    %cst_31 = arith.constant dense<0.000000e+00> : vector<16xf32>
    %120 = vector.multi_reduction <add>, %119, %cst_31 [1] : vector<16x32xf32> to vector<16xf32>
    %121 = vector.shape_cast %120 : vector<16xf32> to vector<16x1xf32>
    %cst_32 = arith.constant 3.200000e+01 : f32
    %122 = vector.broadcast %cst_32 : f32 to vector<16x1xf32>
    %123 = arith.divf %121, %122 : vector<16x1xf32>
    %124 = vector.broadcast %116 : vector<16x1xf32> to vector<16x32xf32>
    %125 = arith.subf %112, %124 : vector<16x32xf32>
    %cst_33 = arith.constant 9.99999974E-6 : f32
    %126 = vector.broadcast %cst_33 : f32 to vector<16x1xf32>
    %127 = arith.addf %123, %126 : vector<16x1xf32>
    %128 = math.rsqrt %127 : vector<16x1xf32>
    %129 = vector.broadcast %128 : vector<16x1xf32> to vector<16x32xf32>
    %130 = arith.mulf %125, %129 : vector<16x32xf32>
    %131 = vector.broadcast %9 : vector<1x32xf32> to vector<16x32xf32>
    %132 = arith.mulf %130, %131 : vector<16x32xf32>
    %133 = vector.broadcast %10 : vector<1x32xf32> to vector<16x32xf32>
    %134 = arith.addf %132, %133 : vector<16x32xf32>
    %c1 = arith.constant 1 : index
    %c0_34 = arith.constant 0 : index
    %c0_35 = arith.constant 0 : index
    %135 = vector.load %arg5[%c1, %c0_34, %c0_35] : memref<2x8x96xf32, #tpu.memory_space<vmem>>, vector<1x8x96xf32>
    %136 = vector.shape_cast %135 : vector<1x8x96xf32> to vector<8x96xf32>
    %137 = vector.extract_strided_slice %136 {offsets = [0, 0], sizes = [1, 96], strides = [1, 1]} : vector<8x96xf32> to vector<1x96xf32>
    %138 = vector.extract_strided_slice %136 {offsets = [1, 0], sizes = [1, 32], strides = [1, 1]} : vector<8x96xf32> to vector<1x32xf32>
    %139 = vector.extract_strided_slice %136 {offsets = [2, 0], sizes = [1, 32], strides = [1, 1]} : vector<8x96xf32> to vector<1x32xf32>
    %140 = vector.extract_strided_slice %136 {offsets = [3, 0], sizes = [1, 32], strides = [1, 1]} : vector<8x96xf32> to vector<1x32xf32>
    %141 = vector.extract_strided_slice %136 {offsets = [4, 0], sizes = [1, 64], strides = [1, 1]} : vector<8x96xf32> to vector<1x64xf32>
    %142 = vector.extract_strided_slice %136 {offsets = [5, 0], sizes = [1, 32], strides = [1, 1]} : vector<8x96xf32> to vector<1x32xf32>
    %143 = vector.extract_strided_slice %136 {offsets = [6, 0], sizes = [1, 32], strides = [1, 1]} : vector<8x96xf32> to vector<1x32xf32>
    %144 = vector.extract_strided_slice %136 {offsets = [7, 0], sizes = [1, 32], strides = [1, 1]} : vector<8x96xf32> to vector<1x32xf32>
    %145 = arith.truncf %134 : vector<16x32xf32> to vector<16x32xbf16>
    %c1_36 = arith.constant 1 : index
    %c0_37 = arith.constant 0 : index
    %c0_38 = arith.constant 0 : index
    %146 = vector.load %arg1[%c1_36, %c0_37, %c0_38] : memref<2x32x96xbf16, #tpu.memory_space<vmem>>, vector<1x32x96xbf16>
    %147 = vector.shape_cast %146 : vector<1x32x96xbf16> to vector<32x96xbf16>
    %cst_39 = arith.constant dense<0.000000e+00> : vector<16x96xf32>
    %148 = tpu.matmul %145, %147, %cst_39 {dimension_numbers = #tpu.dot_dimension_numbers<[1], [0], [0], [1], [0, 0, 1, 1], [], []>} : vector<16x32xbf16>, vector<32x96xbf16>, vector<16x96xf32> -> vector<16x96xf32>
    %149 = vector.broadcast %137 : vector<1x96xf32> to vector<16x96xf32>
    %150 = arith.addf %148, %149 : vector<16x96xf32>
    %151 = vector.extract_strided_slice %150 {offsets = [0, 0], sizes = [16, 8], strides = [1, 1]} : vector<16x96xf32> to vector<16x8xf32>
    %152 = vector.shape_cast %151 : vector<16x8xf32> to vector<2x8x8xf32>
    %153 = vector.extract_strided_slice %150 {offsets = [0, 8], sizes = [16, 8], strides = [1, 1]} : vector<16x96xf32> to vector<16x8xf32>
    %154 = vector.shape_cast %153 : vector<16x8xf32> to vector<2x8x8xf32>
    %155 = vector.extract_strided_slice %150 {offsets = [0, 16], sizes = [16, 8], strides = [1, 1]} : vector<16x96xf32> to vector<16x8xf32>
    %156 = vector.shape_cast %155 : vector<16x8xf32> to vector<2x8x8xf32>
    %157 = vector.extract_strided_slice %150 {offsets = [0, 24], sizes = [16, 8], strides = [1, 1]} : vector<16x96xf32> to vector<16x8xf32>
    %158 = vector.shape_cast %157 : vector<16x8xf32> to vector<2x8x8xf32>
    %159 = tpu.concatenate %152, %154, %156, %158 in 0 : vector<2x8x8xf32>, vector<2x8x8xf32>, vector<2x8x8xf32>, vector<2x8x8xf32> -> vector<8x8x8xf32>
    %160 = arith.truncf %159 : vector<8x8x8xf32> to vector<8x8x8xbf16>
    %161 = vector.extract_strided_slice %150 {offsets = [0, 32], sizes = [16, 8], strides = [1, 1]} : vector<16x96xf32> to vector<16x8xf32>
    %162 = vector.shape_cast %161 : vector<16x8xf32> to vector<2x8x8xf32>
    %163 = vector.extract_strided_slice %150 {offsets = [0, 40], sizes = [16, 8], strides = [1, 1]} : vector<16x96xf32> to vector<16x8xf32>
    %164 = vector.shape_cast %163 : vector<16x8xf32> to vector<2x8x8xf32>
    %165 = vector.extract_strided_slice %150 {offsets = [0, 48], sizes = [16, 8], strides = [1, 1]} : vector<16x96xf32> to vector<16x8xf32>
    %166 = vector.shape_cast %165 : vector<16x8xf32> to vector<2x8x8xf32>
    %167 = vector.extract_strided_slice %150 {offsets = [0, 56], sizes = [16, 8], strides = [1, 1]} : vector<16x96xf32> to vector<16x8xf32>
    %168 = vector.shape_cast %167 : vector<16x8xf32> to vector<2x8x8xf32>
    %169 = tpu.concatenate %162, %164, %166, %168 in 0 : vector<2x8x8xf32>, vector<2x8x8xf32>, vector<2x8x8xf32>, vector<2x8x8xf32> -> vector<8x8x8xf32>
    %170 = arith.truncf %169 : vector<8x8x8xf32> to vector<8x8x8xbf16>
    %171 = vector.extract_strided_slice %150 {offsets = [0, 64], sizes = [16, 8], strides = [1, 1]} : vector<16x96xf32> to vector<16x8xf32>
    %172 = vector.shape_cast %171 : vector<16x8xf32> to vector<2x8x8xf32>
    %173 = vector.extract_strided_slice %150 {offsets = [0, 72], sizes = [16, 8], strides = [1, 1]} : vector<16x96xf32> to vector<16x8xf32>
    %174 = vector.shape_cast %173 : vector<16x8xf32> to vector<2x8x8xf32>
    %175 = vector.extract_strided_slice %150 {offsets = [0, 80], sizes = [16, 8], strides = [1, 1]} : vector<16x96xf32> to vector<16x8xf32>
    %176 = vector.shape_cast %175 : vector<16x8xf32> to vector<2x8x8xf32>
    %177 = vector.extract_strided_slice %150 {offsets = [0, 88], sizes = [16, 8], strides = [1, 1]} : vector<16x96xf32> to vector<16x8xf32>
    %178 = vector.shape_cast %177 : vector<16x8xf32> to vector<2x8x8xf32>
    %179 = tpu.concatenate %172, %174, %176, %178 in 0 : vector<2x8x8xf32>, vector<2x8x8xf32>, vector<2x8x8xf32>, vector<2x8x8xf32> -> vector<8x8x8xf32>
    %180 = arith.truncf %179 : vector<8x8x8xf32> to vector<8x8x8xbf16>
    "tpu.trace_start"() <{level = 10 : i32, message = "bqd,bkd->bqk"}> : () -> ()
    %cst_40 = arith.constant dense<0.000000e+00> : vector<8x8x8xf32>
    %181 = tpu.matmul %160, %170, %cst_40 {dimension_numbers = #tpu.dot_dimension_numbers<[2], [2], [1], [1], [0, 0, 0, 1, 1, 1], [0], [0]>} : vector<8x8x8xbf16>, vector<8x8x8xbf16>, vector<8x8x8xf32> -> vector<8x8x8xf32>
    "tpu.trace_stop"() : () -> ()
    %cst_41 = arith.constant dense<0xFF800000> : vector<8x8xf32>
    %182 = vector.multi_reduction <maximumf>, %181, %cst_41 [2] : vector<8x8x8xf32> to vector<8x8xf32>
    %183 = vector.shape_cast %182 : vector<8x8xf32> to vector<8x8x1xf32>
    %184 = vector.broadcast %183 : vector<8x8x1xf32> to vector<8x8x8xf32>
    %185 = arith.subf %181, %184 : vector<8x8x8xf32>
    %186 = math.exp %185 : vector<8x8x8xf32>
    %cst_42 = arith.constant dense<0.000000e+00> : vector<8x8xf32>
    %187 = vector.multi_reduction <add>, %186, %cst_42 [2] : vector<8x8x8xf32> to vector<8x8xf32>
    %188 = vector.shape_cast %187 : vector<8x8xf32> to vector<8x8x1xf32>
    %189 = tpu.reciprocal %188 {approx = true} : vector<8x8x1xf32> -> vector<8x8x1xf32>
    %190 = vector.broadcast %189 : vector<8x8x1xf32> to vector<8x8x8xf32>
    %191 = arith.mulf %186, %190 : vector<8x8x8xf32>
    %192 = arith.truncf %191 : vector<8x8x8xf32> to vector<8x8x8xbf16>
    "tpu.trace_start"() <{level = 10 : i32, message = "bqk,bkd->bqd"}> : () -> ()
    %cst_43 = arith.constant dense<0.000000e+00> : vector<8x8x8xf32>
    %193 = tpu.matmul %192, %180, %cst_43 {dimension_numbers = #tpu.dot_dimension_numbers<[2], [1], [1], [2], [0, 0, 0, 1, 1, 2], [0], [0]>} : vector<8x8x8xbf16>, vector<8x8x8xbf16>, vector<8x8x8xf32> -> vector<8x8x8xf32>
    "tpu.trace_stop"() : () -> ()
    %194 = vector.extract_strided_slice %193 {offsets = [0, 0, 0], sizes = [2, 8, 8], strides = [1, 1, 1]} : vector<8x8x8xf32> to vector<2x8x8xf32>
    %195 = vector.shape_cast %194 : vector<2x8x8xf32> to vector<16x8xf32>
    %196 = vector.extract_strided_slice %193 {offsets = [2, 0, 0], sizes = [2, 8, 8], strides = [1, 1, 1]} : vector<8x8x8xf32> to vector<2x8x8xf32>
    %197 = vector.shape_cast %196 : vector<2x8x8xf32> to vector<16x8xf32>
    %198 = vector.extract_strided_slice %193 {offsets = [4, 0, 0], sizes = [2, 8, 8], strides = [1, 1, 1]} : vector<8x8x8xf32> to vector<2x8x8xf32>
    %199 = vector.shape_cast %198 : vector<2x8x8xf32> to vector<16x8xf32>
    %200 = vector.extract_strided_slice %193 {offsets = [6, 0, 0], sizes = [2, 8, 8], strides = [1, 1, 1]} : vector<8x8x8xf32> to vector<2x8x8xf32>
    %201 = vector.shape_cast %200 : vector<2x8x8xf32> to vector<16x8xf32>
    %202 = tpu.concatenate %195, %197, %199, %201 in 1 : vector<16x8xf32>, vector<16x8xf32>, vector<16x8xf32>, vector<16x8xf32> -> vector<16x32xf32>
    %203 = arith.truncf %202 : vector<16x32xf32> to vector<16x32xbf16>
    %c1_44 = arith.constant 1 : index
    %c0_45 = arith.constant 0 : index
    %c0_46 = arith.constant 0 : index
    %204 = vector.load %arg2[%c1_44, %c0_45, %c0_46] : memref<2x32x32xbf16, #tpu.memory_space<vmem>>, vector<1x32x32xbf16>
    %205 = vector.shape_cast %204 : vector<1x32x32xbf16> to vector<32x32xbf16>
    %cst_47 = arith.constant dense<0.000000e+00> : vector<16x32xf32>
    %206 = tpu.matmul %203, %205, %cst_47 {dimension_numbers = #tpu.dot_dimension_numbers<[1], [0], [0], [1], [0, 0, 1, 1], [], []>} : vector<16x32xbf16>, vector<32x32xbf16>, vector<16x32xf32> -> vector<16x32xf32>
    %207 = vector.broadcast %138 : vector<1x32xf32> to vector<16x32xf32>
    %208 = arith.addf %206, %207 : vector<16x32xf32>
    %209 = arith.addf %134, %208 : vector<16x32xf32>
    %cst_48 = arith.constant dense<0.000000e+00> : vector<16xf32>
    %210 = vector.multi_reduction <add>, %209, %cst_48 [1] : vector<16x32xf32> to vector<16xf32>
    %211 = vector.shape_cast %210 : vector<16xf32> to vector<16x1xf32>
    %cst_49 = arith.constant 3.200000e+01 : f32
    %212 = vector.broadcast %cst_49 : f32 to vector<16x1xf32>
    %213 = arith.divf %211, %212 : vector<16x1xf32>
    %214 = vector.broadcast %213 : vector<16x1xf32> to vector<16x32xf32>
    %215 = arith.subf %209, %214 : vector<16x32xf32>
    %216 = arith.mulf %215, %215 : vector<16x32xf32>
    %cst_50 = arith.constant dense<0.000000e+00> : vector<16xf32>
    %217 = vector.multi_reduction <add>, %216, %cst_50 [1] : vector<16x32xf32> to vector<16xf32>
    %218 = vector.shape_cast %217 : vector<16xf32> to vector<16x1xf32>
    %cst_51 = arith.constant 3.200000e+01 : f32
    %219 = vector.broadcast %cst_51 : f32 to vector<16x1xf32>
    %220 = arith.divf %218, %219 : vector<16x1xf32>
    %221 = vector.broadcast %213 : vector<16x1xf32> to vector<16x32xf32>
    %222 = arith.subf %209, %221 : vector<16x32xf32>
    %cst_52 = arith.constant 9.99999974E-6 : f32
    %223 = vector.broadcast %cst_52 : f32 to vector<16x1xf32>
    %224 = arith.addf %220, %223 : vector<16x1xf32>
    %225 = math.rsqrt %224 : vector<16x1xf32>
    %226 = vector.broadcast %225 : vector<16x1xf32> to vector<16x32xf32>
    %227 = arith.mulf %222, %226 : vector<16x32xf32>
    %228 = vector.broadcast %139 : vector<1x32xf32> to vector<16x32xf32>
    %229 = arith.mulf %227, %228 : vector<16x32xf32>
    %230 = vector.broadcast %140 : vector<1x32xf32> to vector<16x32xf32>
    %231 = arith.addf %229, %230 : vector<16x32xf32>
    %232 = arith.truncf %231 : vector<16x32xf32> to vector<16x32xbf16>
    %c1_53 = arith.constant 1 : index
    %c0_54 = arith.constant 0 : index
    %c0_55 = arith.constant 0 : index
    %233 = vector.load %arg3[%c1_53, %c0_54, %c0_55] : memref<2x32x64xbf16, #tpu.memory_space<vmem>>, vector<1x32x64xbf16>
    %234 = vector.shape_cast %233 : vector<1x32x64xbf16> to vector<32x64xbf16>
    %cst_56 = arith.constant dense<0.000000e+00> : vector<16x64xf32>
    %235 = tpu.matmul %232, %234, %cst_56 {dimension_numbers = #tpu.dot_dimension_numbers<[1], [0], [0], [1], [0, 0, 1, 1], [], []>} : vector<16x32xbf16>, vector<32x64xbf16>, vector<16x64xf32> -> vector<16x64xf32>
    %236 = vector.broadcast %141 : vector<1x64xf32> to vector<16x64xf32>
    %237 = arith.addf %235, %236 : vector<16x64xf32>
    %cst_57 = arith.constant 0.000000e+00 : f32
    %238 = vector.broadcast %cst_57 : f32 to vector<16x64xf32>
    %239 = arith.maximumf %237, %238 : vector<16x64xf32>
    %240 = arith.truncf %239 : vector<16x64xf32> to vector<16x64xbf16>
    %c1_58 = arith.constant 1 : index
    %c0_59 = arith.constant 0 : index
    %c0_60 = arith.constant 0 : index
    %241 = vector.load %arg4[%c1_58, %c0_59, %c0_60] : memref<2x64x32xbf16, #tpu.memory_space<vmem>>, vector<1x64x32xbf16>
    %242 = vector.shape_cast %241 : vector<1x64x32xbf16> to vector<64x32xbf16>
    %cst_61 = arith.constant dense<0.000000e+00> : vector<16x32xf32>
    %243 = tpu.matmul %240, %242, %cst_61 {dimension_numbers = #tpu.dot_dimension_numbers<[1], [0], [0], [1], [0, 0, 1, 1], [], []>} : vector<16x64xbf16>, vector<64x32xbf16>, vector<16x32xf32> -> vector<16x32xf32>
    %244 = vector.broadcast %142 : vector<1x32xf32> to vector<16x32xf32>
    %245 = arith.addf %243, %244 : vector<16x32xf32>
    %246 = arith.addf %231, %245 : vector<16x32xf32>
    %cst_62 = arith.constant dense<0.000000e+00> : vector<16xf32>
    %247 = vector.multi_reduction <add>, %246, %cst_62 [1] : vector<16x32xf32> to vector<16xf32>
    %248 = vector.shape_cast %247 : vector<16xf32> to vector<16x1xf32>
    %cst_63 = arith.constant 3.200000e+01 : f32
    %249 = vector.broadcast %cst_63 : f32 to vector<16x1xf32>
    %250 = arith.divf %248, %249 : vector<16x1xf32>
    %251 = vector.broadcast %250 : vector<16x1xf32> to vector<16x32xf32>
    %252 = arith.subf %246, %251 : vector<16x32xf32>
    %253 = arith.mulf %252, %252 : vector<16x32xf32>
    %cst_64 = arith.constant dense<0.000000e+00> : vector<16xf32>
    %254 = vector.multi_reduction <add>, %253, %cst_64 [1] : vector<16x32xf32> to vector<16xf32>
    %255 = vector.shape_cast %254 : vector<16xf32> to vector<16x1xf32>
    %cst_65 = arith.constant 3.200000e+01 : f32
    %256 = vector.broadcast %cst_65 : f32 to vector<16x1xf32>
    %257 = arith.divf %255, %256 : vector<16x1xf32>
    %258 = vector.broadcast %250 : vector<16x1xf32> to vector<16x32xf32>
    %259 = arith.subf %246, %258 : vector<16x32xf32>
    %cst_66 = arith.constant 9.99999974E-6 : f32
    %260 = vector.broadcast %cst_66 : f32 to vector<16x1xf32>
    %261 = arith.addf %257, %260 : vector<16x1xf32>
    %262 = math.rsqrt %261 : vector<16x1xf32>
    %263 = vector.broadcast %262 : vector<16x1xf32> to vector<16x32xf32>
    %264 = arith.mulf %259, %263 : vector<16x32xf32>
    %265 = vector.broadcast %143 : vector<1x32xf32> to vector<16x32xf32>
    %266 = arith.mulf %264, %265 : vector<16x32xf32>
    %267 = vector.broadcast %144 : vector<1x32xf32> to vector<16x32xf32>
    %268 = arith.addf %266, %267 : vector<16x32xf32>
    %c0_67 = arith.constant 0 : index
    %c0_68 = arith.constant 0 : index
    %269 = vector.load %arg6[%c0_67, %c0_68] : memref<2x32xf32, #tpu.memory_space<vmem>>, vector<1x32xf32>
    %c1_69 = arith.constant 1 : index
    %c0_70 = arith.constant 0 : index
    %270 = vector.load %arg6[%c1_69, %c0_70] : memref<2x32xf32, #tpu.memory_space<vmem>>, vector<1x32xf32>
    %cst_71 = arith.constant dense<0.000000e+00> : vector<16xf32>
    %271 = vector.multi_reduction <add>, %268, %cst_71 [1] : vector<16x32xf32> to vector<16xf32>
    %272 = vector.shape_cast %271 : vector<16xf32> to vector<16x1xf32>
    %cst_72 = arith.constant 3.200000e+01 : f32
    %273 = vector.broadcast %cst_72 : f32 to vector<16x1xf32>
    %274 = arith.divf %272, %273 : vector<16x1xf32>
    %275 = vector.broadcast %274 : vector<16x1xf32> to vector<16x32xf32>
    %276 = arith.subf %268, %275 : vector<16x32xf32>
    %277 = arith.mulf %276, %276 : vector<16x32xf32>
    %cst_73 = arith.constant dense<0.000000e+00> : vector<16xf32>
    %278 = vector.multi_reduction <add>, %277, %cst_73 [1] : vector<16x32xf32> to vector<16xf32>
    %279 = vector.shape_cast %278 : vector<16xf32> to vector<16x1xf32>
    %cst_74 = arith.constant 3.200000e+01 : f32
    %280 = vector.broadcast %cst_74 : f32 to vector<16x1xf32>
    %281 = arith.divf %279, %280 : vector<16x1xf32>
    %282 = vector.broadcast %274 : vector<16x1xf32> to vector<16x32xf32>
    %283 = arith.subf %268, %282 : vector<16x32xf32>
    %cst_75 = arith.constant 9.99999974E-6 : f32
    %284 = vector.broadcast %cst_75 : f32 to vector<16x1xf32>
    %285 = arith.addf %281, %284 : vector<16x1xf32>
    %286 = math.rsqrt %285 : vector<16x1xf32>
    %287 = vector.broadcast %286 : vector<16x1xf32> to vector<16x32xf32>
    %288 = arith.mulf %283, %287 : vector<16x32xf32>
    %289 = vector.broadcast %269 : vector<1x32xf32> to vector<16x32xf32>
    %290 = arith.mulf %288, %289 : vector<16x32xf32>
    %291 = vector.broadcast %270 : vector<1x32xf32> to vector<16x32xf32>
    %292 = arith.addf %290, %291 : vector<16x32xf32>
    %c0_76 = arith.constant 0 : index
    %c0_77 = arith.constant 0 : index
    %293 = vector.load %arg7[%c0_76, %c0_77] : memref<16x32xf32, #tpu.memory_space<vmem>>, vector<16x32xf32>
    tpu.vector_store %arg7[%c0_76, %c0_77], %292 {strides = array<i32>} : memref<16x32xf32, #tpu.memory_space<vmem>>, vector<16x32xf32>,
    return
  }
}

</mosaic_0001>

<bundles_post_ra>
// kernel: _encoder_forward_impl.1
= control target key start
LH: loop header
LB: loop body
LE: loop exit
PB: predicated region body
PF: predicated region fallthrough
CT: control target
= control target key end

     0   :  { %12 = vsyncpa [#allocation3], 0  ;;  %s4032_s0 = inlined_call_operand.hbm [shape: f32[16,32], index: 0, kind: input, shape index: {}]   ;;  %s4033_s1 = inlined_call_operand.vmem [shape: bf16[2,32,96], index: 1, kind: input, shape index: {}]   ;;  %s4034_s2 = inlined_call_operand.vmem [shape: bf16[2,32,32], index: 2, kind: input, shape index: {}]   ;;  %s4035_s3 = inlined_call_operand.vmem [shape: bf16[2,32,64], index: 3, kind: input, shape index: {}]   ;;  %s4036_s4 = inlined_call_operand.vmem [shape: bf16[2,64,32], index: 4, kind: input, shape index: {}]   ;;  %s4037_s5 = inlined_call_operand.hbm [shape: f32[2,8,96], index: 5, kind: input, shape index: {}]   ;;  %s4038_s6 = inlined_call_operand.vmem [shape: f32[2,32], index: 6, kind: input, shape index: {}]   ;;  %s4039_s7 = inlined_call_operand.hbm [shape: f32[16,32], index: 7, kind: output, shape index: {}]  }
   0x1   :  { %13 = vsyncpa [#allocation6], 0 }
   0x2   :  { %14 = vsyncpa [#allocation4], 0  ;;  %s3390_s24 = smov [#allocation2]  }
   0x3   :  { %s20_s25 = sshll.u32 %s3390_s24, 4  ;;  %s21_s25 = int_to_ptr.vmem [resolvable:$true] %s20_s25 }
   0x4   :  { %s3332_s26 = scalar_lea.vmem %s21_s25, 256  ;;  %p3337_p1 = scmp.lt.s32.totalorder %s21_s25, %s21_s25 }
   0x5   :  { %p3333_p0 = scmp.ne.s32.totalorder %s21_s25, %s3332_s26  ;;  %p3338_p2 = scmp.lt.s32.totalorder %s3332_s26, %s3332_s26 }
   0x7   :  { %p3339_p3 = por %p3338_p2, %p3337_p1 }
   0x9   :  { %p3340_p4 = pnand %p3339_p3, %p3333_p0 }
   0xb   :  { %3343 = shalt.err (!%p3340_p4)
}
   0xc   :  { %s3391_s27 = smov 128   ;;  %s3392_s28 = smov 8  }
   0xd   :  { %26 = dma.hbm_to_vmem [thread:$0]  %s4032_s0, 256, %s21_s25, [#allocation3], %s3391_s27, %s3391_s27, %s3392_s28  }
   0xe   :  { %s3393_s8 = smov [#allocation5]  }
   0xf   :  { %s40_s9 = sshll.u32 %s3393_s8, 4  ;;  %s41_s9 = int_to_ptr.vmem [resolvable:$true] %s40_s9 }
  0x10   :  { %s3352_s10 = scalar_lea.vmem %s41_s9, 256  ;;  %p3357_p6 = scmp.lt.s32.totalorder %s41_s9, %s41_s9 }
  0x11   :  { %p3353_p5 = scmp.ne.s32.totalorder %s41_s9, %s3352_s10  ;;  %p3358_p7 = scmp.lt.s32.totalorder %s3352_s10, %s3352_s10 }
  0x13   :  { %p3359_p8 = por %p3358_p7, %p3357_p6 }
  0x15   :  { %p3360_p9 = pnand %p3359_p8, %p3353_p5 }
  0x17   :  { %3363 = shalt.err (!%p3360_p9)
}
  0x18   :  { %46 = dma.hbm_to_vmem [thread:$0]  %s4037_s5, 256, %s41_s9, [#allocation6], %s3391_s27, %s3391_s27, %s3392_s28  }
  0x19   :  { %3384 = dma.done.wait [#allocation3], 256  }
  0x1a   :  { %3385 = vsyncadd [#allocation3], 4294967040 }
  0x1b   :  { %3386 = dma.done.wait [#allocation6], 256  }
  0x1c   :  { %3387 = vsyncadd [#allocation6], 4294967040  ;;  %v3394_v0 = vmov 0.0   ;;  %vm3395_vm0 = vmmov 0   ;;  %v3220_v1 = vld [vmem:[%s4033_s1 + $0x8] sm:$0xff]   ;;  %v3221_v2 = vld [vmem:[%s4033_s1] sm:$0xff]   ;;  %v64_v6 = vlaneseq }
  0x1d   :  { %2882 = vmatprep.subr.bf16.mxu1 %v3394_v0  ;;  %2886 = vmatprep.mubr.msk.bf16.mxu1 %vm3395_vm0, %v3394_v0  ;;  %v3468_v3 = vld [vmem:[#allocation2] sm:$0xff]  ;;  %v3470_v4 = vld [vmem:[#allocation2 + $0x8] sm:$0xff]  ;;  %vm80_vm1 = vcmask 261120   ;;  %v3482_v9 = vld [vmem:[#allocation5] sm:$0xff]  ;;  %s3396_s15 = smov 104   ;;  %s3397_s16 = smov 120  }
  0x1e   :  { %2896 = vmatprep.subr.bf16.mxu0 %v3394_v0  ;;  %2898 = vmatprep.mubr.msk.bf16.mxu0 %vm3395_vm0, %v3394_v0  ;;  %v59_v5 = vpack.c.bf16 %v3470_v4, %v3468_v3  ;;  %v3479_v7 = vshrl.u32 %v64_v6, 7  ;;  %s3398_s17 = smov 96   ;;  %s3399_s18 = smov 112   ;;  %vm156_vm2 = vcmask 64512   ;;  %vm647_vm3 = vcmask 1043456  }
  0x1f   :  { %2883 = vmatpush3.bf16.msra.mxu1 %v3220_v1  ;;  %s3400_s19 = smov 64   ;;  %s3401_s24 = smov 16   ;;  %vm1053_vm4 = vcmask 130048   ;;  %vm1056_vm5 = vcmask 195584   ;;  %vm1269_vm6 = vcmask 523264  }
  0x20   :  { %2884 = vmatprep.subr.bf16.mxu1 %v3394_v0  ;;  %v66_v8 = vsub.s32 0, %v3479_v7  ;;  %s3402_s25 = smov 24   ;;  %s3403_s13 = smov [#allocation7]  }
  0x21   :  { %s2695_s5 = sshll.u32 %s3403_s13, 4  ;;  %s2696_s5 = int_to_ptr.vmem [resolvable:$true] %s2695_s5 }
  0x22   :  { %v67_v11 = vrot.slane %v3482_v9, %v66_v8  ;;  %s3364_s14 = scalar_lea.vmem %s2696_s5, 256  ;;  %p3369_p11 = scmp.lt.s32.totalorder %s2696_s5, %s2696_s5 }
  0x23   :  { %2885 = vmatpush3.bf16.msra.mxu1 %v3221_v2  ;;  %p3365_p10 = scmp.ne.s32.totalorder %s2696_s5, %s3364_s14  ;;  %p3370_p12 = scmp.lt.s32.totalorder %s3364_s14, %s3364_s14 }
  0x24   :  { %2890 = vmatprep.subr.bf16.mxu1 %v3394_v0 }
  0x25   :  { %p3371_p13 = por %p3370_p12, %p3369_p11 }
  0x26   :  { %2887 = vmatmul.mubr.msk.bf16.vlgmr.msra.gmra.mxu1 %vm80_vm1, %v59_v5 }
  0x27   :  { %2892 = vmatprep.mubr.msk.bf16.mxu1 %vm3395_vm0, %v3394_v0  ;;  %p3372_p0 = pnand %p3371_p13, %p3365_p10 }
  0xe6   :  { %v118_v10 = vpop.f32.mrf.mxu1 }
  0xe7   :  { %v119_v14 = vadd.f32 %v118_v10, %v67_v11 }
  0xe8   :  { %v2888_v12 = vpop.f32.mrf.mxu1 }
  0xe9   :  { %v145_v18 = vpack.c.bf16 %v119_v14, %v119_v14 }
  0xea   :  { %v121_v13 = vpop.f32.mrf.mxu1 }
  0xeb   :  { %v122_v15 = vadd.f32 %v121_v13, %v67_v11 }
  0xec   :  { %v2889_v16 = vpop.f32.mrf.mxu1 }
  0xed   :  { %v3170_v17 = vpack.i.bf16 %v122_v15, %v119_v14  ;;  %v146_v19 = vpack.c.bf16 %v122_v15, %v122_v15 }
  0xef   :  { %3171 = vrot.lane.b32.xlu1 %v3170_v17, %s3396_s15  ;;  %3161 = vrot.lane.b32.xlu0 %v3170_v17, %s3397_s16 }
  0xf3   :  { %154 = vrot.lane.b32.xlu1 %v145_v18, %s3398_s17  ;;  %3166 = vrot.lane.b32.xlu0 %v3170_v17, %s3399_s18 }
  0xf7   :  { %204 = vrot.lane.b32.xlu0 %v146_v19, %s3398_s17 }
 0x161   :  { %v3172_v20 = vpop.permute.xlu1 %3171  ;;  %v3162_v21 = vpop.permute.xlu0 %3161 }
 0x162   :  { %v3164_v22 = vunpack.i.h.bf16 %v3162_v21  ;;  %v3163_v23 = vunpack.i.l.bf16 %v3162_v21  ;;  %v3173_v31 = vunpack.i.l.bf16 %v3172_v20  ;;  %v3174_v34 = vunpack.i.h.bf16 %v3172_v20 }
 0x164   :  { %v3492_v24 = vpack.c.bf16 %v3164_v22, %v3164_v22  ;;  %v3494_v25 = vpack.c.bf16 %v3163_v23, %v3163_v23  ;;  %v3511_v37 = vpack.c.bf16 %v3173_v31, %v3173_v31  ;;  %v3514_v38 = vpack.c.bf16 %v3174_v34, %v3174_v34 }
 0x165   :  { %v155_v26 = vpop.permute.xlu1 %154  ;;  %v3167_v27 = vpop.permute.xlu0 %3166 }
 0x166   :  { %v161_v28 = vsel %vm156_vm2, %v155_v26, 0  ;;  %v3169_v29 = vunpack.i.h.bf16 %v3167_v27  ;;  %v3168_v30 = vunpack.i.l.bf16 %v3167_v27  ;;  %253 = vrot.lane.b32.xlu1 %v3494_v25, %s3398_s17  ;;  %302 = vrot.lane.b32.xlu0 %v3492_v24, %s3398_s17 }
 0x167   :  { %2891 = vmatpush3.bf16.xpose.msra.mxu1 %v161_v28 }
 0x168   :  { %v3501_v32 = vpack.c.bf16 %v3169_v29, %v3169_v29  ;;  %v3503_v33 = vpack.c.bf16 %v3168_v30, %v3168_v30  ;;  %2902 = vmatprep.subr.bf16.mxu1 %v3394_v0 }
 0x169   :  { %v205_v35 = vpop.permute.xlu0 %204 }
 0x16a   :  { %351 = vrot.lane.b32.xlu1 %v3503_v33, %s3398_s17  ;;  %400 = vrot.lane.b32.xlu0 %v3501_v32, %s3398_s17  ;;  %v210_v36 = vsel %vm156_vm2, %v205_v35, 0 }
 0x16b   :  { %2897 = vmatpush3.bf16.xpose.msra.mxu0 %v210_v36 }
 0x16c   :  { %2908 = vmatprep.subr.bf16.mxu0 %v3394_v0 }
 0x16e   :  { %2893 = vmatmul.mubr.msk.bf16.vlgmr.msra.gmra.mxu1 %vm156_vm2, %v145_v18  ;;  %449 = vrot.lane.b32.xlu1 %v3511_v37, %s3398_s17 }
 0x16f   :  { %498 = vrot.lane.b32.xlu0 %v3514_v38, %s3398_s17  ;;  %2904 = vmatprep.mubr.msk.bf16.mxu1 %vm3395_vm0, %v3394_v0 }
 0x172   :  { %691 = vrot.lane.b32.xlu1 %v146_v19, %s3400_s19  ;;  %2899 = vmatmul.mubr.msk.bf16.vlgmr.msra.gmra.mxu0 %vm156_vm2, %v146_v19 }
 0x173   :  { %642 = vrot.lane.b32.xlu0 %v145_v18, %s3400_s19  ;;  %2910 = vmatprep.mubr.msk.bf16.mxu0 %vm3395_vm0, %v3394_v0 }
 0x1d8   :  { %v254_v39 = vpop.permute.xlu1 %253  ;;  %v303_v40 = vpop.permute.xlu0 %302 }
 0x1d9   :  { %v259_v41 = vsel %vm156_vm2, %v254_v39, 0  ;;  %v308_v42 = vsel %vm156_vm2, %v303_v40, 0 }
 0x1da   :  { %2903 = vmatpush3.bf16.xpose.msra.mxu1 %v259_v41  ;;  %2909 = vmatpush3.bf16.xpose.msra.mxu0 %v308_v42 }
 0x1db   :  { %2914 = vmatprep.subr.bf16.mxu1 %v3394_v0  ;;  %2920 = vmatprep.subr.bf16.mxu0 %v3394_v0 }
 0x1dc   :  { %v352_v43 = vpop.permute.xlu1 %351  ;;  %v401_v44 = vpop.permute.xlu0 %400 }
 0x1dd   :  { %v357_v45 = vsel %vm156_vm2, %v352_v43, 0  ;;  %v406_v46 = vsel %vm156_vm2, %v401_v44, 0 }
 0x1e0   :  { %v450_v47 = vpop.permute.xlu1 %449 }
 0x1e1   :  { %2905 = vmatmul.mubr.msk.bf16.vlgmr.msra.gmra.mxu1 %vm156_vm2, %v3494_v25  ;;  %2911 = vmatmul.mubr.msk.bf16.vlgmr.msra.gmra.mxu0 %vm156_vm2, %v3492_v24  ;;  %v499_v48 = vpop.permute.xlu0 %498  ;;  %v455_v49 = vsel %vm156_vm2, %v450_v47, 0 }
 0x1e2   :  { %2915 = vmatpush3.bf16.xpose.msra.mxu1 %v357_v45  ;;  %2921 = vmatpush3.bf16.xpose.msra.mxu0 %v406_v46  ;;  %v504_v50 = vsel %vm156_vm2, %v499_v48, 0 }
 0x1e3   :  { %2916 = vmatprep.mubr.msk.bf16.mxu1 %vm3395_vm0, %v3394_v0  ;;  %2922 = vmatprep.mubr.msk.bf16.mxu0 %vm3395_vm0, %v3394_v0 }
 0x1e4   :  { %2926 = vmatprep.subr.bf16.mxu1 %v3394_v0  ;;  %2932 = vmatprep.subr.bf16.mxu0 %v3394_v0  ;;  %v692_v51 = vpop.permute.xlu1 %691 }
 0x1e5   :  { %v643_v52 = vpop.permute.xlu0 %642  ;;  %v697_v53 = vsel %vm647_vm3, %v692_v51, 0 }
 0x1e6   :  { %v649_v54 = vsel %vm647_vm3, %v643_v52, 0 }
 0x1e9   :  { %2917 = vmatmul.mubr.msk.bf16.vlgmr.msra.gmra.mxu1 %vm156_vm2, %v3503_v33  ;;  %2923 = vmatmul.mubr.msk.bf16.vlgmr.msra.gmra.mxu0 %vm156_vm2, %v3501_v32 }
 0x1ea   :  { %2927 = vmatpush3.bf16.xpose.msra.mxu1 %v455_v49  ;;  %2933 = vmatpush3.bf16.xpose.msra.mxu0 %v504_v50 }
 0x1eb   :  { %2928 = vmatprep.mubr.msk.bf16.mxu1 %vm3395_vm0, %v3394_v0  ;;  %2934 = vmatprep.mubr.msk.bf16.mxu0 %vm3395_vm0, %v3394_v0 }
 0x1ec   :  { %2938 = vmatprep.subr.bf16.mxu1 %v3394_v0  ;;  %2944 = vmatprep.subr.bf16.mxu0 %v3394_v0 }
 0x1f1   :  { %2929 = vmatmul.mubr.msk.bf16.vlgmr.msra.gmra.mxu1 %vm156_vm2, %v3511_v37  ;;  %2935 = vmatmul.mubr.msk.bf16.vlgmr.msra.gmra.mxu0 %vm156_vm2, %v3514_v38 }
 0x1f2   :  { %2939 = vmatpush3.bf16.msra.mxu1 %v649_v54  ;;  %2945 = vmatpush3.bf16.msra.mxu0 %v697_v53 }
 0x1f3   :  { %2940 = vmatprep.mubr.msk.bf16.mxu1 %vm3395_vm0, %v3394_v0  ;;  %2946 = vmatprep.mubr.msk.bf16.mxu0 %vm3395_vm0, %v3394_v0 }
 0x1f4   :  { %2950 = vmatprep.subr.bf16.mxu1 %v3394_v0  ;;  %2956 = vmatprep.subr.bf16.mxu0 %v3394_v0 }
 0x22e   :  { %v197_v55 = vpop.f32.mrf.mxu1 }
 0x22f   :  { %v546_v56 = vsel %vm156_vm2, %v197_v55, -inf }
 0x230   :  { %547 = vmax.xlane.f32.xlu1 %v546_v56  ;;  %v2894_v57 = vpop.f32.mrf.mxu1 }
 0x232   :  { %v200_v58 = vpop.f32.mrf.mxu1  ;;  %v246_v59 = vpop.f32.mrf.mxu0 }
 0x233   :  { %v549_v60 = vsel %vm156_vm2, %v246_v59, -inf }
 0x234   :  { %550 = vmax.xlane.f32.xlu0 %v549_v60  ;;  %v2895_v61 = vpop.f32.mrf.mxu1  ;;  %v2900_v62 = vpop.f32.mrf.mxu0 }
 0x236   :  { %v249_v63 = vpop.f32.mrf.mxu0 }
 0x238   :  { %v2901_v1 = vpop.f32.mrf.mxu0 }
 0x2a1   :  { %v295_v2 = vpop.f32.mrf.mxu1  ;;  %v344_v5 = vpop.f32.mrf.mxu0 }
 0x2a2   :  { %v555_v6 = vsel %vm156_vm2, %v344_v5, -inf  ;;  %v552_v10 = vsel %vm156_vm2, %v295_v2, -inf }
 0x2a3   :  { %v2912_v11 = vpop.f32.mrf.mxu0  ;;  %556 = vmax.xlane.f32.xlu1 %v555_v6  ;;  %553 = vmax.xlane.f32.xlu0 %v552_v10  ;;  %v2906_v12 = vpop.f32.mrf.mxu1 }
 0x2a5   :  { %v298_v13 = vpop.f32.mrf.mxu1  ;;  %v347_v14 = vpop.f32.mrf.mxu0 }
 0x2a7   :  { %v2907_v15 = vpop.f32.mrf.mxu1  ;;  %v2913_v16 = vpop.f32.mrf.mxu0 }
 0x2a9   :  { %v3572_v17 = vpop.f32.mrf.mxu1  ;;  %v442_v18 = vpop.f32.mrf.mxu0 }
 0x2aa   :  { %v561_v19 = vsel %vm156_vm2, %v442_v18, -inf  ;;  %v558_v20 = vsel %vm156_vm2, %v3572_v17, -inf }
 0x2ab   :  { %v2924_v21 = vpop.f32.mrf.mxu0  ;;  %562 = vmax.xlane.f32.xlu1 %v561_v19  ;;  %559 = vmax.xlane.f32.xlu0 %v558_v20  ;;  %v2918_v22 = vpop.f32.mrf.mxu1 }
 0x2ad   :  { %v396_v23 = vpop.f32.mrf.mxu1  ;;  %v445_v26 = vpop.f32.mrf.mxu0 }
 0x2af   :  { %v2919_v27 = vpop.f32.mrf.mxu1  ;;  %v2925_v28 = vpop.f32.mrf.mxu0 }
 0x2b1   :  { %v3577_v29 = vpop.f32.mrf.mxu1  ;;  %v540_v30 = vpop.f32.mrf.mxu0 }
 0x2b2   :  { %v567_v31 = vsel %vm156_vm2, %v540_v30, -inf  ;;  %v564_v34 = vsel %vm156_vm2, %v3577_v29, -inf }
 0x2b3   :  { %v2936_v35 = vpop.f32.mrf.mxu0  ;;  %568 = vmax.xlane.f32.xlu1 %v567_v31  ;;  %565 = vmax.xlane.f32.xlu0 %v564_v34  ;;  %v2930_v36 = vpop.f32.mrf.mxu1 }
 0x2b5   :  { %v494_v39 = vpop.f32.mrf.mxu1  ;;  %v543_v40 = vpop.f32.mrf.mxu0 }
 0x2b7   :  { %v2931_v41 = vpop.f32.mrf.mxu1  ;;  %v2937_v42 = vpop.f32.mrf.mxu0 }
 0x2b9   :  { %v548_v43 = vpop.xlane.xlu1 %547 }
 0x2ba   :  { %v570_v45 = vsub.f32 %v197_v55, %v548_v43 }
 0x2bc   :  { %v578_v47 = vmul.f32 1.442695, %v570_v45 }
 0x2bd   :  { %v551_v44 = vpop.xlane.xlu0 %550 }
 0x2be   :  { %v571_v46 = vsub.f32 %v246_v59, %v551_v44  ;;  %3240 = vpow2.f32 %v578_v47 }
 0x2c0   :  { %v580_v48 = vmul.f32 1.442695, %v571_v46 }
 0x2c2   :  { %3242 = vpow2.f32 %v580_v48 }
 0x2c4   :  { %739 = vrot.lane.b32.xlu1 %v3494_v25, %s3400_s19 }
 0x2c9   :  { %787 = vrot.lane.b32.xlu0 %v3492_v24, %s3400_s19 }
 0x2cb   :  { %v3241_v49 = vpop.eup %3240 }
 0x2cc   :  { %v594_v52 = vsel %vm156_vm2, %v3241_v49, 0.0 }
 0x2cf   :  { %v3243_v50 = vpop.eup %3242 }
 0x2d0   :  { %v597_v51 = vsel %vm156_vm2, %v3243_v50, 0.0 }
 0x2e8   :  { %598 = vadd.xlane.f32.xlu1 %v597_v51  ;;  %595 = vadd.xlane.f32.xlu0 %v594_v52 }
 0x2f9   :  { %835 = vrot.lane.b32.xlu1 %v3503_v33, %s3400_s19 }
 0x32c   :  { %v557_v24 = vpop.xlane.xlu1 %556  ;;  %v554_v25 = vpop.xlane.xlu0 %553 }
 0x32d   :  { %v573_v53 = vsub.f32 %v344_v5, %v557_v24  ;;  %v572_v54 = vsub.f32 %v295_v2, %v554_v25 }
 0x32f   :  { %v584_v55 = vmul.f32 1.442695, %v573_v53  ;;  %v582_v56 = vmul.f32 1.442695, %v572_v54 }
 0x331   :  { %3244 = vpow2.f32 %v584_v55 }
 0x332   :  { %3246 = vpow2.f32 %v582_v56 }
 0x334   :  { %v563_v57 = vpop.xlane.xlu1 %562  ;;  %v560_v12 = vpop.xlane.xlu0 %559 }
 0x335   :  { %v575_v58 = vsub.f32 %v442_v18, %v563_v57  ;;  %v574_v13 = vsub.f32 %v3572_v17, %v560_v12 }
 0x337   :  { %v588_v59 = vmul.f32 1.442695, %v575_v58  ;;  %v586_v15 = vmul.f32 1.442695, %v574_v13 }
 0x339   :  { %3248 = vpow2.f32 %v588_v59 }
 0x33c   :  { %v569_v60 = vpop.xlane.xlu1 %568  ;;  %v566_v14 = vpop.xlane.xlu0 %565 }
 0x33d   :  { %v577_v61 = vsub.f32 %v540_v30, %v569_v60  ;;  %v576_v16 = vsub.f32 %v3577_v29, %v566_v14 }
 0x33e   :  { %v3245_v62 = vpop.eup %3244 }
 0x33f   :  { %v3590_v63 = vpop.eup %3246  ;;  %v592_v1 = vmul.f32 1.442695, %v577_v61  ;;  %v603_v33 = vsel %vm156_vm2, %v3245_v62, 0.0  ;;  %v590_v18 = vmul.f32 1.442695, %v576_v16 }
 0x340   :  { %604 = vadd.xlane.f32.xlu1 %v603_v33  ;;  %v600_v2 = vsel %vm156_vm2, %v3590_v63, 0.0  ;;  %v740_v19 = vpop.permute.xlu1 %739  ;;  %v788_v20 = vpop.permute.xlu0 %787 }
 0x341   :  { %3250 = vpow2.f32 %v592_v1  ;;  %601 = vadd.xlane.f32.xlu0 %v600_v2  ;;  %v793_v34 = vsel %vm647_vm3, %v788_v20, 0  ;;  %v745_v35 = vsel %vm647_vm3, %v740_v19, 0 }
 0x342   :  { %3252 = vpow2.f32 %v586_v15 }
 0x343   :  { %3254 = vpow2.f32 %v590_v18 }
 0x346   :  { %v3595_v5 = vpop.eup %3248 }
 0x347   :  { %v609_v6 = vsel %vm156_vm2, %v3595_v5, 0.0 }
 0x348   :  { %610 = vadd.xlane.f32.xlu1 %v609_v6 }
 0x34e   :  { %v3599_v10 = vpop.eup %3250 }
 0x34f   :  { %v615_v11 = vsel %vm156_vm2, %v3599_v10, 0.0  ;;  %v3609_v23 = vpop.eup %3252 }
 0x350   :  { %616 = vadd.xlane.f32.xlu1 %v615_v11  ;;  %v3613_v17 = vpop.eup %3254 }
 0x357   :  { %883 = vrot.lane.b32.xlu0 %v3501_v32, %s3400_s19  ;;  %v606_v32 = vsel %vm156_vm2, %v3609_v23, 0.0 }
 0x361   :  { %931 = vrot.lane.b32.xlu1 %v3511_v37, %s3400_s19  ;;  %v612_v37 = vsel %vm156_vm2, %v3613_v17, 0.0 }
 0x371   :  { %v599_v21 = vpop.xlane.xlu1 %598  ;;  %v596_v22 = vpop.xlane.xlu0 %595 }
 0x372   :  { %3256 = vrcp.f32 %v599_v21 }
 0x373   :  { %3258 = vrcp.f32 %v596_v22 }
 0x375   :  { %v836_v36 = vpop.permute.xlu1 %835 }
 0x376   :  { %607 = vadd.xlane.f32.xlu0 %v606_v32 }
 0x37a   :  { %613 = vadd.xlane.f32.xlu0 %v612_v37 }
 0x37f   :  { %v3257_v26 = vpop.eup %3256 }
 0x380   :  { %v3259_v27 = vpop.eup %3258  ;;  %v627_v28 = vmul.f32 %v3257_v26, %v3243_v50 }
 0x381   :  { %v626_v29 = vmul.f32 %v3259_v27, %v3241_v49 }
 0x382   :  { %v635_v30 = vpack.c.bf16 %v627_v28, %v627_v28 }
 0x383   :  { %v634_v31 = vpack.c.bf16 %v626_v29, %v626_v29  ;;  %v3222_v29 = vld [vmem:[%s4034_s2 + $0x8] sm:$0xff]  }
 0x384   :  { %2947 = vmatmul.mubr.msk.bf16.vlgmr.msra.gmra.mxu0 %vm156_vm2, %v635_v30 }
 0x385   :  { %2941 = vmatmul.mubr.msk.bf16.vlgmr.msra.gmra.mxu1 %vm156_vm2, %v634_v31  ;;  %2957 = vmatpush3.bf16.msra.mxu0 %v793_v34 }
 0x386   :  { %2951 = vmatpush3.bf16.msra.mxu1 %v745_v35  ;;  %2952 = vmatprep.mubr.msk.bf16.mxu1 %vm3395_vm0, %v3394_v0  ;;  %v3223_v35 = vld [vmem:[%s4034_s2] sm:$0xff]  }
 0x387   :  { %2958 = vmatprep.mubr.msk.bf16.mxu0 %vm3395_vm0, %v3394_v0  ;;  %2962 = vmatprep.subr.bf16.mxu1 %v3394_v0 }
 0x388   :  { %2968 = vmatprep.subr.bf16.mxu0 %v3394_v0 }
 0x390   :  { %979 = vrot.lane.b32.xlu0 %v3514_v38, %s3400_s19  ;;  %v841_v38 = vsel %vm647_vm3, %v836_v36, 0 }
 0x3c9   :  { %v605_v39 = vpop.xlane.xlu1 %604 }
 0x3ca   :  { %3260 = vrcp.f32 %v605_v39  ;;  %v602_v40 = vpop.xlane.xlu0 %601 }
 0x3cb   :  { %3262 = vrcp.f32 %v602_v40 }
 0x3ce   :  { %v884_v45 = vpop.permute.xlu0 %883 }
 0x3cf   :  { %v889_v49 = vsel %vm647_vm3, %v884_v45, 0 }
 0x3d1   :  { %v611_v41 = vpop.xlane.xlu1 %610 }
 0x3d2   :  { %3264 = vrcp.f32 %v611_v41 }
 0x3d7   :  { %v3261_v42 = vpop.eup %3260 }
 0x3d8   :  { %v3263_v43 = vpop.eup %3262  ;;  %v629_v44 = vmul.f32 %v3261_v42, %v3245_v62 }
 0x3d9   :  { %v628_v46 = vmul.f32 %v3263_v43, %v3590_v63  ;;  %v617_v24 = vpop.xlane.xlu1 %616 }
 0x3da   :  { %v637_v47 = vpack.c.bf16 %v629_v44, %v629_v44  ;;  %3266 = vrcp.f32 %v617_v24 }
 0x3db   :  { %v636_v48 = vpack.c.bf16 %v628_v46, %v628_v46 }
 0x3dc   :  { %2959 = vmatmul.mubr.msk.bf16.vlgmr.msra.gmra.mxu0 %vm156_vm2, %v637_v47 }
 0x3dd   :  { %2953 = vmatmul.mubr.msk.bf16.vlgmr.msra.gmra.mxu1 %vm156_vm2, %v636_v48  ;;  %2969 = vmatpush3.bf16.msra.mxu0 %v889_v49  ;;  %v932_v61 = vpop.permute.xlu1 %931 }
 0x3de   :  { %2963 = vmatpush3.bf16.msra.mxu1 %v841_v38  ;;  %2970 = vmatprep.mubr.msk.bf16.mxu0 %vm3395_vm0, %v3394_v0  ;;  %v937_v1 = vsel %vm647_vm3, %v932_v61, 0 }
 0x3df   :  { %v3265_v50 = vpop.eup %3264  ;;  %2980 = vmatprep.subr.bf16.mxu0 %v3394_v0  ;;  %2964 = vmatprep.mubr.msk.bf16.mxu1 %vm3395_vm0, %v3394_v0 }
 0x3e0   :  { %v631_v51 = vmul.f32 %v3265_v50, %v3595_v5  ;;  %2974 = vmatprep.subr.bf16.mxu1 %v3394_v0 }
 0x3e2   :  { %v639_v52 = vpack.c.bf16 %v631_v51, %v631_v51 }
 0x3e4   :  { %2971 = vmatmul.mubr.msk.bf16.vlgmr.msra.gmra.mxu0 %vm156_vm2, %v639_v52 }
 0x3e5   :  { %2982 = vmatprep.mubr.msk.bf16.mxu0 %vm3395_vm0, %v3394_v0 }
 0x3e7   :  { %v3267_v53 = vpop.eup %3266 }
 0x3e8   :  { %v633_v55 = vmul.f32 %v3267_v53, %v3599_v10 }
 0x3ea   :  { %v641_v58 = vpack.c.bf16 %v633_v55, %v633_v55 }
 0x3ff   :  { %v608_v25 = vpop.xlane.xlu0 %607 }
 0x400   :  { %3268 = vrcp.f32 %v608_v25 }
 0x403   :  { %v614_v54 = vpop.xlane.xlu0 %613 }
 0x404   :  { %3270 = vrcp.f32 %v614_v54 }
 0x407   :  { %v980_v56 = vpop.permute.xlu0 %979 }
 0x408   :  { %v985_v57 = vsel %vm647_vm3, %v980_v56, 0 }
 0x409   :  { %2981 = vmatpush3.bf16.msra.mxu0 %v985_v57 }
 0x40a   :  { %2994 = vmatprep.subr.bf16.mxu0 %v3394_v0 }
 0x40c   :  { %2983 = vmatmul.mubr.msk.bf16.vlgmr.msra.gmra.mxu0 %vm156_vm2, %v641_v58 }
 0x40d   :  { %v3269_v59 = vpop.eup %3268  ;;  %2998 = vmatprep.mubr.msk.bf16.mxu0 %vm3395_vm0, %v3394_v0 }
 0x40e   :  { %v630_v60 = vmul.f32 %v3269_v59, %v3609_v23 }
 0x410   :  { %v638_v62 = vpack.c.bf16 %v630_v60, %v630_v60 }
 0x411   :  { %v3271_v63 = vpop.eup %3270 }
 0x412   :  { %2965 = vmatmul.mubr.msk.bf16.vlgmr.msra.gmra.mxu1 %vm156_vm2, %v638_v62  ;;  %v632_v33 = vmul.f32 %v3271_v63, %v3613_v17  ;;  %v1066_v62 = vsub.s32 1, %v3479_v7 }
 0x413   :  { %2975 = vmatpush3.bf16.msra.mxu1 %v937_v1  ;;  %2976 = vmatprep.mubr.msk.bf16.mxu1 %vm3395_vm0, %v3394_v0 }
 0x414   :  { %2986 = vmatprep.subr.bf16.mxu1 %v3394_v0  ;;  %v640_v2 = vpack.c.bf16 %v632_v33, %v632_v33  ;;  %v1067_v63 = vrot.slane %v3482_v9, %v1066_v62 }
 0x41a   :  { %2977 = vmatmul.mubr.msk.bf16.vlgmr.msra.gmra.mxu1 %vm156_vm2, %v640_v2 }
 0x41b   :  { %2990 = vmatprep.mubr.msk.bf16.mxu1 %vm3395_vm0, %v3394_v0  ;;  %2987 = vmatpush3.bf16.msra.mxu1 %v3222_v29 }
 0x41c   :  { %2988 = vmatprep.subr.bf16.mxu1 %v3394_v0 }
 0x41f   :  { %2989 = vmatpush3.bf16.msra.mxu1 %v3223_v35 }
 0x420   :  { %3002 = vmatprep.subr.bf16.mxu1 %v3394_v0 }
 0x444   :  { %v733_v5 = vpop.f32.mrf.mxu0 }
 0x445   :  { %v685_v6 = vpop.f32.mrf.mxu1 }
 0x446   :  { %v2948_v10 = vpop.f32.mrf.mxu0 }
 0x447   :  { %v2942_v11 = vpop.f32.mrf.mxu1 }
 0x448   :  { %v736_v12 = vpop.f32.mrf.mxu0 }
 0x449   :  { %v688_v13 = vpop.f32.mrf.mxu1 }
 0x44a   :  { %v2949_v14 = vpop.f32.mrf.mxu0 }
 0x44b   :  { %v2943_v15 = vpop.f32.mrf.mxu1 }
 0x49c   :  { %v829_v16 = vpop.f32.mrf.mxu0 }
 0x49d   :  { %v781_v18 = vpop.f32.mrf.mxu1 }
 0x49e   :  { %v3175_v19 = vpack.i.bf16 %v829_v16, %v781_v18  ;;  %v2960_v20 = vpop.f32.mrf.mxu0 }
 0x49f   :  { %v2954_v21 = vpop.f32.mrf.mxu1 }
 0x4a0   :  { %3176 = vrot.lane.b32.xlu1 %v3175_v19, %s3392_s28  ;;  %v832_v22 = vpop.f32.mrf.mxu0 }
 0x4a1   :  { %v784_v23 = vpop.f32.mrf.mxu1 }
 0x4a2   :  { %v2961_v32 = vpop.f32.mrf.mxu0 }
 0x4a3   :  { %v2955_v17 = vpop.f32.mrf.mxu1 }
 0x4a4   :  { %v925_v37 = vpop.f32.mrf.mxu0  ;;  %v3225_v17 = vld [vmem:[%s4035_s3] sm:$0xff]  }
 0x4a6   :  { %v2972_v26 = vpop.f32.mrf.mxu0 }
 0x4a8   :  { %v928_v27 = vpop.f32.mrf.mxu0 }
 0x4aa   :  { %v2973_v28 = vpop.f32.mrf.mxu0 }
 0x4cc   :  { %v1021_v30 = vpop.f32.mrf.mxu0 }
 0x4ce   :  { %v2984_v31 = vpop.f32.mrf.mxu0 }
 0x4d0   :  { %v1024_v34 = vpop.f32.mrf.mxu0 }
 0x4d1   :  { %v1155_v34 = vsub.s32 2, %v3479_v7 }
 0x4d2   :  { %v877_v36 = vpop.f32.mrf.mxu1  ;;  %v2985_v39 = vpop.f32.mrf.mxu0 }
 0x4d3   :  { %v3180_v40 = vpack.i.bf16 %v925_v37, %v877_v36  ;;  %v3226_v37 = vld [vmem:[%s4036_s4 + $0x18] sm:$0xff]   ;;  %v1156_v39 = vrot.slane %v3482_v9, %v1155_v34 }
 0x4d4   :  { %v2966_v41 = vpop.f32.mrf.mxu1 }
 0x4d5   :  { %3181 = vrot.lane.b32.xlu0 %v3180_v40, %s3401_s24  ;;  %v1161_v40 = vsub.s32 3, %v3479_v7 }
 0x4d6   :  { %v880_v42 = vpop.f32.mrf.mxu1 }
 0x4d8   :  { %v2967_v43 = vpop.f32.mrf.mxu1 }
 0x4da   :  { %v973_v44 = vpop.f32.mrf.mxu1 }
 0x4db   :  { %v3185_v45 = vpack.i.bf16 %v1021_v30, %v973_v44  ;;  %v1162_v44 = vrot.slane %v3482_v9, %v1161_v40 }
 0x4dc   :  { %v2978_v46 = vpop.f32.mrf.mxu1 }
 0x4dd   :  { %3186 = vrot.lane.b32.xlu1 %v3185_v45, %s3402_s25 }
 0x4de   :  { %v976_v47 = vpop.f32.mrf.mxu1 }
 0x4e0   :  { %v2979_v48 = vpop.f32.mrf.mxu1 }
 0x512   :  { %v3177_v49 = vpop.permute.xlu1 %3176 }
 0x513   :  { %v3179_v50 = vunpack.i.h.bf16 %v3177_v49  ;;  %v3178_v51 = vunpack.i.l.bf16 %v3177_v49  ;;  %v3227_v49 = vld [vmem:[%s4036_s4 + $0x10] sm:$0xff]  }
 0x515   :  { %v1052_v53 = vsel %vm156_vm2, %v733_v5, %v3179_v50  ;;  %v1051_v54 = vsel %vm156_vm2, %v685_v6, %v3178_v51  ;;  %v3229_v50 = vld [vmem:[%s4036_s4] sm:$0xff]   ;;  %v1172_v51 = vsub.s32 4, %v3479_v7 }
 0x547   :  { %v3182_v38 = vpop.permute.xlu0 %3181 }
 0x548   :  { %v3184_v52 = vunpack.i.h.bf16 %v3182_v38  ;;  %v3183_v24 = vunpack.i.l.bf16 %v3182_v38  ;;  %v3228_v38 = vld [vmem:[%s4036_s4 + $0x8] sm:$0xff]  }
 0x54a   :  { %v1055_v57 = vsel %vm1053_vm4, %v1052_v53, %v3184_v52  ;;  %v1054_v58 = vsel %vm1053_vm4, %v1051_v54, %v3183_v24  ;;  %v1173_v52 = vrot.slane %v3482_v9, %v1172_v51 }
 0x54f   :  { %v3187_v25 = vpop.permute.xlu1 %3186 }
 0x550   :  { %v3189_v55 = vunpack.i.h.bf16 %v3187_v25  ;;  %v3188_v56 = vunpack.i.l.bf16 %v3187_v25 }
 0x552   :  { %v1058_v59 = vsel %vm1056_vm5, %v1055_v57, %v3189_v55  ;;  %v1057_v60 = vsel %vm1056_vm5, %v1054_v58, %v3188_v56 }
 0x553   :  { %v1059_v61 = vpack.c.bf16 %v1058_v59, %v1057_v60  ;;  %v1243_v60 = vsub.s32 5, %v3479_v7 }
 0x555   :  { %2991 = vmatmul.mubr.msk.bf16.vlgmr.msra.gmra.mxu1 %vm80_vm1, %v1059_v61  ;;  %v1244_v61 = vrot.slane %v3482_v9, %v1243_v60 }
 0x556   :  { %3010 = vmatprep.mubr.msk.bf16.mxu1 %vm3395_vm0, %v3394_v0  ;;  %3003 = vmatpush3.bf16.msra.mxu1 %v3226_v37 }
 0x557   :  { %3004 = vmatprep.subr.bf16.mxu1 %v3394_v0 }
 0x55a   :  { %3005 = vmatpush3.bf16.msra.mxu1 %v3227_v49  ;;  %v3765_v49 = vld [vmem:[#allocation5 + $0x8] sm:$0xff] }
 0x55b   :  { %3006 = vmatprep.subr.bf16.mxu1 %v3394_v0 }
 0x55e   :  { %3007 = vmatpush3.bf16.msra.mxu1 %v3228_v38 }
 0x55f   :  { %3008 = vmatprep.subr.bf16.mxu1 %v3394_v0 }
 0x562   :  { %3009 = vmatpush3.bf16.msra.mxu1 %v3229_v50 }
 0x563   :  { %3028 = vmatprep.subr.bf16.mxu1 %v3394_v0 }
 0x615   :  { %v1117_v1 = vpop.f32.mrf.mxu1 }
 0x616   :  { %v1118_v33 = vadd.f32 %v1117_v1, %v1067_v63 }
 0x617   :  { %v2992_v2 = vpop.f32.mrf.mxu1 }
 0x618   :  { %v1124_v5 = vadd.f32 %v1118_v33, %v3468_v3 }
 0x619   :  { %v1120_v6 = vpop.f32.mrf.mxu1 }
 0x61a   :  { %v1121_v10 = vadd.f32 %v1120_v6, %v1067_v63  ;;  %v1126_v11 = vsel %vm80_vm1, %v1124_v5, 0.0 }
 0x61b   :  { %1127 = vadd.xlane.f32.xlu0 %v1126_v11  ;;  %v2993_v12 = vpop.f32.mrf.mxu1 }
 0x61c   :  { %v1125_v13 = vadd.f32 %v1121_v10, %v3470_v4  ;;  %v3224_v4 = vld [vmem:[%s4035_s3 + $0x8] sm:$0xff]  }
 0x61d   :  { %2995 = vmatpush3.bf16.msra.mxu0 %v3224_v4  ;;  %v3231_v4 = vld [vmem:[%s4033_s1 + $0x10] sm:$0xff]  }
 0x61e   :  { %v1129_v14 = vsel %vm80_vm1, %v1125_v13, 0.0  ;;  %2996 = vmatprep.subr.bf16.mxu0 %v3394_v0 }
 0x61f   :  { %1130 = vadd.xlane.f32.xlu1 %v1129_v14 }
 0x621   :  { %2997 = vmatpush3.bf16.msra.mxu0 %v3225_v17 }
 0x622   :  { %3014 = vmatprep.subr.bf16.mxu0 %v3394_v0 }
 0x6a4   :  { %v1128_v15 = vpop.xlane.xlu0 %1127 }
 0x6a5   :  { %v1133_v16 = vmul.f32 0.03125, %v1128_v15 }
 0x6a7   :  { %v1135_v18 = vsub.f32 %v1124_v5, %v1133_v16 }
 0x6a8   :  { %v1131_v19 = vpop.xlane.xlu1 %1130 }
 0x6a9   :  { %v1134_v20 = vmul.f32 0.03125, %v1131_v19  ;;  %v1137_v21 = vmul.f32 %v1135_v18, %v1135_v18 }
 0x6ab   :  { %v1136_v22 = vsub.f32 %v1125_v13, %v1134_v20  ;;  %v1139_v3 = vsel %vm80_vm1, %v1137_v21, 0.0 }
 0x6ac   :  { %1140 = vadd.xlane.f32.xlu0 %v1139_v3 }
 0x6ad   :  { %v1138_v23 = vmul.f32 %v1136_v22, %v1136_v22 }
 0x6af   :  { %v1142_v32 = vsel %vm80_vm1, %v1138_v23, 0.0 }
 0x6b0   :  { %1143 = vadd.xlane.f32.xlu0 %v1142_v32  ;;  %v3230_v32 = vld [vmem:[%s4033_s1 + $0x18] sm:$0xff]  }
 0x735   :  { %v1141_v26 = vpop.xlane.xlu0 %1140 }
 0x736   :  { %v1145_v27 = vmul.f32 0.03125, %v1141_v26 }
 0x738   :  { %v1147_v28 = vadd.f32 1e-05, %v1145_v27 }
 0x739   :  { %v1144_v29 = vpop.xlane.xlu0 %1143 }
 0x73a   :  { %3272 = vrsqrt.f32 %v1147_v28  ;;  %v1146_v30 = vmul.f32 0.03125, %v1144_v29 }
 0x73c   :  { %v1148_v31 = vadd.f32 1e-05, %v1146_v30  ;;  %v1344_v30 = vsub.s32 6, %v3479_v7 }
 0x73e   :  { %3274 = vrsqrt.f32 %v1148_v31 }
 0x747   :  { %v3273_v35 = vpop.eup %3272 }
 0x748   :  { %v1151_v36 = vmul.f32 %v3273_v35, %v1135_v18 }
 0x74a   :  { %v1157_v43 = vmul.f32 %v1156_v39, %v1151_v36  ;;  %v1345_v36 = vrot.slane %v3482_v9, %v1344_v30 }
 0x74b   :  { %v3275_v41 = vpop.eup %3274 }
 0x74c   :  { %v1152_v42 = vmul.f32 %v3275_v41, %v1136_v22  ;;  %v1163_v46 = vadd.f32 %v1162_v44, %v1157_v43 }
 0x74e   :  { %v1158_v45 = vmul.f32 %v1156_v39, %v1152_v42  ;;  %v1350_v39 = vsub.s32 7, %v3479_v7 }
 0x750   :  { %v1164_v47 = vadd.f32 %v1162_v44, %v1158_v45  ;;  %v1351_v44 = vrot.slane %v3482_v9, %v1350_v39  ;;  %v1365_v9 = vrot.slane %v3765_v49, %v66_v8 }
 0x752   :  { %v1165_v48 = vpack.c.bf16 %v1164_v47, %v1163_v46 }
 0x754   :  { %2999 = vmatmul.mubr.msk.bf16.vlgmr.msra.gmra.mxu0 %vm80_vm1, %v1165_v48 }
 0x755   :  { %3018 = vmatprep.mubr.msk.bf16.mxu0 %vm3395_vm0, %v3394_v0  ;;  %3015 = vmatpush3.bf16.msra.mxu0 %v3230_v32 }
 0x756   :  { %3016 = vmatprep.subr.bf16.mxu0 %v3394_v0 }
 0x759   :  { %3017 = vmatpush3.bf16.msra.mxu0 %v3231_v4 }
 0x75a   :  { %3022 = vmatprep.subr.bf16.mxu0 %v3394_v0 }
 0x814   :  { %v1223_v24 = vpop.f32.mrf.mxu0 }
 0x815   :  { %v1224_v53 = vadd.f32 %v1223_v24, %v1173_v52 }
 0x816   :  { %v3000_v25 = vpop.f32.mrf.mxu0 }
 0x817   :  { %v1230_v57 = vmax.f32 %v1224_v53, 0.0 }
 0x818   :  { %v1226_v54 = vpop.f32.mrf.mxu0 }
 0x819   :  { %v1227_v55 = vadd.f32 %v1226_v54, %v1173_v52 }
 0x81a   :  { %v3001_v56 = vpop.f32.mrf.mxu0 }
 0x81b   :  { %v1231_v58 = vmax.f32 %v1227_v55, 0.0 }
 0x81d   :  { %v1232_v59 = vpack.c.bf16 %v1231_v58, %v1230_v57 }
 0x81f   :  { %3011 = vmatmul.mubr.msk.bf16.vlgmr.msra.gmra.mxu1 %vm1269_vm6, %v1232_v59 }
 0x820   :  { %3030 = vmatprep.mubr.msk.bf16.mxu1 %vm3395_vm0, %v3394_v0 }
 0x8df   :  { %v1307_v63 = vpop.f32.mrf.mxu1 }
 0x8e0   :  { %v1308_v1 = vadd.f32 %v1307_v63, %v1244_v61 }
 0x8e1   :  { %v3012_v33 = vpop.f32.mrf.mxu1 }
 0x8e2   :  { %v1314_v2 = vadd.f32 %v1308_v1, %v1163_v46 }
 0x8e3   :  { %v1310_v5 = vpop.f32.mrf.mxu1 }
 0x8e4   :  { %v1311_v6 = vadd.f32 %v1310_v5, %v1244_v61  ;;  %v1316_v10 = vsel %vm80_vm1, %v1314_v2, 0.0 }
 0x8e5   :  { %1317 = vadd.xlane.f32.xlu1 %v1316_v10  ;;  %v3013_v11 = vpop.f32.mrf.mxu1 }
 0x8e6   :  { %v1315_v12 = vadd.f32 %v1311_v6, %v1164_v47 }
 0x8e8   :  { %v1319_v13 = vsel %vm80_vm1, %v1315_v12, 0.0 }
 0x8e9   :  { %1320 = vadd.xlane.f32.xlu0 %v1319_v13 }
 0x96e   :  { %v1318_v14 = vpop.xlane.xlu1 %1317 }
 0x96f   :  { %v1322_v15 = vmul.f32 0.03125, %v1318_v14 }
 0x971   :  { %v1324_v16 = vsub.f32 %v1314_v2, %v1322_v15 }
 0x972   :  { %v1321_v18 = vpop.xlane.xlu0 %1320 }
 0x973   :  { %v1323_v19 = vmul.f32 0.03125, %v1321_v18  ;;  %v1326_v20 = vmul.f32 %v1324_v16, %v1324_v16 }
 0x975   :  { %v1325_v21 = vsub.f32 %v1315_v12, %v1323_v19  ;;  %v1328_v22 = vsel %vm80_vm1, %v1326_v20, 0.0 }
 0x976   :  { %1329 = vadd.xlane.f32.xlu1 %v1328_v22 }
 0x977   :  { %v1327_v3 = vmul.f32 %v1325_v21, %v1325_v21 }
 0x979   :  { %v1331_v23 = vsel %vm80_vm1, %v1327_v3, 0.0 }
 0x97a   :  { %1332 = vadd.xlane.f32.xlu0 %v1331_v23 }
 0x9ff   :  { %v1330_v17 = vpop.xlane.xlu1 %1329 }
 0xa00   :  { %v1334_v37 = vmul.f32 0.03125, %v1330_v17 }
 0xa02   :  { %v1336_v26 = vadd.f32 1e-05, %v1334_v37 }
 0xa03   :  { %v1333_v27 = vpop.xlane.xlu0 %1332 }
 0xa04   :  { %3276 = vrsqrt.f32 %v1336_v26  ;;  %v1335_v28 = vmul.f32 0.03125, %v1333_v27 }
 0xa06   :  { %v1337_v29 = vadd.f32 1e-05, %v1335_v28 }
 0xa08   :  { %3278 = vrsqrt.f32 %v1337_v29 }
 0xa11   :  { %v3277_v31 = vpop.eup %3276 }
 0xa12   :  { %v1340_v35 = vmul.f32 %v3277_v31, %v1324_v16 }
 0xa14   :  { %v1346_v43 = vmul.f32 %v1345_v36, %v1340_v35 }
 0xa15   :  { %v3279_v41 = vpop.eup %3278 }
 0xa16   :  { %v1341_v42 = vmul.f32 %v3279_v41, %v1325_v21  ;;  %v3756_v46 = vadd.f32 %v1351_v44, %v1346_v43 }
 0xa18   :  { %v1347_v45 = vmul.f32 %v1345_v36, %v1341_v42 }
 0xa1a   :  { %v3758_v47 = vadd.f32 %v1351_v44, %v1347_v45 }
 0xa1c   :  { %v1356_v48 = vpack.c.bf16 %v3758_v47, %v3756_v46 }
 0xa1e   :  { %3019 = vmatmul.mubr.msk.bf16.vlgmr.msra.gmra.mxu0 %vm80_vm1, %v1356_v48 }
 0xa1f   :  { %3024 = vmatprep.mubr.msk.bf16.mxu0 %vm3395_vm0, %v3394_v0 }
 0xade   :  { %v1415_v38 = vpop.f32.mrf.mxu0 }
 0xadf   :  { %v1416_v24 = vadd.f32 %v1415_v38, %v1365_v9 }
 0xae0   :  { %v3020_v50 = vpop.f32.mrf.mxu0 }
 0xae1   :  { %v1442_v56 = vpack.c.bf16 %v1416_v24, %v1416_v24 }
 0xae2   :  { %v1418_v52 = vpop.f32.mrf.mxu0 }
 0xae3   :  { %v1419_v25 = vadd.f32 %v1418_v52, %v1365_v9 }
 0xae4   :  { %v3021_v53 = vpop.f32.mrf.mxu0 }
 0xae5   :  { %v3195_v54 = vpack.i.bf16 %v1419_v25, %v1416_v24  ;;  %v1443_v55 = vpack.c.bf16 %v1419_v25, %v1419_v25 }
 0xae7   :  { %3196 = vrot.lane.b32.xlu0 %v3195_v54, %s3399_s18  ;;  %3191 = vrot.lane.b32.xlu1 %v3195_v54, %s3397_s16 }
 0xaeb   :  { %3201 = vrot.lane.b32.xlu1 %v3195_v54, %s3396_s15  ;;  %1500 = vrot.lane.b32.xlu0 %v1443_v55, %s3398_s17 }
 0xaef   :  { %1451 = vrot.lane.b32.xlu1 %v1442_v56, %s3398_s17 }
 0xb59   :  { %v3197_v57 = vpop.permute.xlu0 %3196  ;;  %v3192_v8 = vpop.permute.xlu1 %3191 }
 0xb5a   :  { %v3194_v58 = vunpack.i.h.bf16 %v3192_v8  ;;  %v3193_v59 = vunpack.i.l.bf16 %v3192_v8  ;;  %v3199_v61 = vunpack.i.h.bf16 %v3197_v57  ;;  %v3198_v63 = vunpack.i.l.bf16 %v3197_v57 }
 0xb5c   :  { %v3775_v1 = vpack.c.bf16 %v3194_v58, %v3194_v58  ;;  %v3777_v33 = vpack.c.bf16 %v3193_v59, %v3193_v59  ;;  %v3784_v10 = vpack.c.bf16 %v3199_v61, %v3199_v61  ;;  %v3786_v11 = vpack.c.bf16 %v3198_v63, %v3198_v63 }
 0xb5d   :  { %v3202_v2 = vpop.permute.xlu1 %3201  ;;  %v1501_v5 = vpop.permute.xlu0 %1500 }
 0xb5e   :  { %v1506_v6 = vsel %vm156_vm2, %v1501_v5, 0  ;;  %1549 = vrot.lane.b32.xlu1 %v3777_v33, %s3398_s17  ;;  %1598 = vrot.lane.b32.xlu0 %v3775_v1, %s3398_s17  ;;  %v3204_v12 = vunpack.i.h.bf16 %v3202_v2  ;;  %v3203_v13 = vunpack.i.l.bf16 %v3202_v2 }
 0xb5f   :  { %3029 = vmatpush3.bf16.xpose.msra.mxu1 %v1506_v6 }
 0xb60   :  { %3040 = vmatprep.subr.bf16.mxu1 %v3394_v0  ;;  %v3794_v16 = vpack.c.bf16 %v3204_v12, %v3204_v12  ;;  %v3796_v18 = vpack.c.bf16 %v3203_v13, %v3203_v13 }
 0xb61   :  { %v1452_v14 = vpop.permute.xlu1 %1451 }
 0xb62   :  { %v1457_v15 = vsel %vm156_vm2, %v1452_v14, 0  ;;  %1647 = vrot.lane.b32.xlu1 %v3786_v11, %s3398_s17  ;;  %1696 = vrot.lane.b32.xlu0 %v3784_v10, %s3398_s17 }
 0xb63   :  { %3023 = vmatpush3.bf16.xpose.msra.mxu0 %v1457_v15 }
 0xb64   :  { %3034 = vmatprep.subr.bf16.mxu0 %v3394_v0 }
 0xb66   :  { %1745 = vrot.lane.b32.xlu1 %v3796_v18, %s3398_s17  ;;  %1794 = vrot.lane.b32.xlu0 %v3794_v16, %s3398_s17 }
 0xb67   :  { %3031 = vmatmul.mubr.msk.bf16.vlgmr.msra.gmra.mxu1 %vm156_vm2, %v1443_v55 }
 0xb68   :  { %3042 = vmatprep.mubr.msk.bf16.mxu1 %vm3395_vm0, %v3394_v0 }
 0xb6a   :  { %3025 = vmatmul.mubr.msk.bf16.vlgmr.msra.gmra.mxu0 %vm156_vm2, %v1442_v56  ;;  %1986 = vrot.lane.b32.xlu1 %v1443_v55, %s3400_s19 }
 0xb6b   :  { %1938 = vrot.lane.b32.xlu0 %v1442_v56, %s3400_s19  ;;  %3036 = vmatprep.mubr.msk.bf16.mxu0 %vm3395_vm0, %v3394_v0 }
 0xbd0   :  { %v1550_v19 = vpop.permute.xlu1 %1549  ;;  %v1599_v20 = vpop.permute.xlu0 %1598 }
 0xbd1   :  { %v1555_v21 = vsel %vm156_vm2, %v1550_v19, 0  ;;  %v1604_v22 = vsel %vm156_vm2, %v1599_v20, 0 }
 0xbd2   :  { %3035 = vmatpush3.bf16.xpose.msra.mxu0 %v1555_v21  ;;  %3041 = vmatpush3.bf16.xpose.msra.mxu1 %v1604_v22 }
 0xbd3   :  { %3046 = vmatprep.subr.bf16.mxu0 %v3394_v0  ;;  %3052 = vmatprep.subr.bf16.mxu1 %v3394_v0 }
 0xbd4   :  { %v1648_v3 = vpop.permute.xlu1 %1647  ;;  %v1697_v23 = vpop.permute.xlu0 %1696 }
 0xbd5   :  { %v1653_v32 = vsel %vm156_vm2, %v1648_v3, 0  ;;  %v1702_v4 = vsel %vm156_vm2, %v1697_v23, 0 }
 0xbd8   :  { %v1746_v17 = vpop.permute.xlu1 %1745  ;;  %v1795_v37 = vpop.permute.xlu0 %1794 }
 0xbd9   :  { %3037 = vmatmul.mubr.msk.bf16.vlgmr.msra.gmra.mxu0 %vm156_vm2, %v3777_v33  ;;  %3043 = vmatmul.mubr.msk.bf16.vlgmr.msra.gmra.mxu1 %vm156_vm2, %v3775_v1  ;;  %v1751_v26 = vsel %vm156_vm2, %v1746_v17, 0  ;;  %v1800_v27 = vsel %vm156_vm2, %v1795_v37, 0 }
 0xbda   :  { %3047 = vmatpush3.bf16.xpose.msra.mxu0 %v1653_v32  ;;  %3053 = vmatpush3.bf16.xpose.msra.mxu1 %v1702_v4 }
 0xbdb   :  { %3048 = vmatprep.mubr.msk.bf16.mxu0 %vm3395_vm0, %v3394_v0  ;;  %3054 = vmatprep.mubr.msk.bf16.mxu1 %vm3395_vm0, %v3394_v0 }
 0xbdc   :  { %3058 = vmatprep.subr.bf16.mxu0 %v3394_v0  ;;  %3064 = vmatprep.subr.bf16.mxu1 %v3394_v0  ;;  %v1987_v28 = vpop.permute.xlu1 %1986 }
 0xbdd   :  { %v1939_v29 = vpop.permute.xlu0 %1938  ;;  %v1992_v31 = vsel %vm647_vm3, %v1987_v28, 0 }
 0xbde   :  { %v1944_v35 = vsel %vm647_vm3, %v1939_v29, 0 }
 0xbe1   :  { %3049 = vmatmul.mubr.msk.bf16.vlgmr.msra.gmra.mxu0 %vm156_vm2, %v3786_v11  ;;  %3055 = vmatmul.mubr.msk.bf16.vlgmr.msra.gmra.mxu1 %vm156_vm2, %v3784_v10 }
 0xbe2   :  { %3059 = vmatpush3.bf16.xpose.msra.mxu0 %v1751_v26  ;;  %3065 = vmatpush3.bf16.xpose.msra.mxu1 %v1800_v27 }
 0xbe3   :  { %3060 = vmatprep.mubr.msk.bf16.mxu0 %vm3395_vm0, %v3394_v0  ;;  %3066 = vmatprep.mubr.msk.bf16.mxu1 %vm3395_vm0, %v3394_v0 }
 0xbe4   :  { %3070 = vmatprep.subr.bf16.mxu0 %v3394_v0  ;;  %3076 = vmatprep.subr.bf16.mxu1 %v3394_v0 }
 0xbe9   :  { %3061 = vmatmul.mubr.msk.bf16.vlgmr.msra.gmra.mxu0 %vm156_vm2, %v3796_v18  ;;  %3067 = vmatmul.mubr.msk.bf16.vlgmr.msra.gmra.mxu1 %vm156_vm2, %v3794_v16 }
 0xbea   :  { %3071 = vmatpush3.bf16.msra.mxu0 %v1944_v35  ;;  %3077 = vmatpush3.bf16.msra.mxu1 %v1992_v31 }
 0xbeb   :  { %3072 = vmatprep.mubr.msk.bf16.mxu0 %vm3395_vm0, %v3394_v0  ;;  %3078 = vmatprep.mubr.msk.bf16.mxu1 %vm3395_vm0, %v3394_v0 }
 0xbec   :  { %3082 = vmatprep.subr.bf16.mxu0 %v3394_v0  ;;  %3088 = vmatprep.subr.bf16.mxu1 %v3394_v0 }
 0xc27   :  { %v1542_v36 = vpop.f32.mrf.mxu1 }
 0xc28   :  { %v1845_v41 = vsel %vm156_vm2, %v1542_v36, -inf }
 0xc29   :  { %1846 = vmax.xlane.f32.xlu0 %v1845_v41  ;;  %v3032_v42 = vpop.f32.mrf.mxu1 }
 0xc2a   :  { %v1493_v43 = vpop.f32.mrf.mxu0 }
 0xc2b   :  { %v1545_v44 = vpop.f32.mrf.mxu1  ;;  %v1842_v45 = vsel %vm156_vm2, %v1493_v43, -inf }
 0xc2c   :  { %1843 = vmax.xlane.f32.xlu1 %v1842_v45  ;;  %v3026_v48 = vpop.f32.mrf.mxu0 }
 0xc2d   :  { %v3033_v38 = vpop.f32.mrf.mxu1 }
 0xc2e   :  { %v1496_v9 = vpop.f32.mrf.mxu0 }
 0xc30   :  { %v3027_v50 = vpop.f32.mrf.mxu0 }
 0xc99   :  { %v1591_v52 = vpop.f32.mrf.mxu0  ;;  %v1640_v24 = vpop.f32.mrf.mxu1 }
 0xc9a   :  { %v1848_v25 = vsel %vm156_vm2, %v1591_v52, -inf  ;;  %v1851_v53 = vsel %vm156_vm2, %v1640_v24, -inf }
 0xc9b   :  { %v3038_v54 = vpop.f32.mrf.mxu0  ;;  %1849 = vmax.xlane.f32.xlu0 %v1848_v25  ;;  %1852 = vmax.xlane.f32.xlu1 %v1851_v53  ;;  %v3044_v55 = vpop.f32.mrf.mxu1 }
 0xc9d   :  { %v1594_v56 = vpop.f32.mrf.mxu0  ;;  %v1643_v57 = vpop.f32.mrf.mxu1 }
 0xc9f   :  { %v3039_v8 = vpop.f32.mrf.mxu0  ;;  %v3045_v58 = vpop.f32.mrf.mxu1 }
 0xca1   :  { %v3855_v59 = vpop.f32.mrf.mxu0  ;;  %v1738_v61 = vpop.f32.mrf.mxu1 }
 0xca2   :  { %v1854_v63 = vsel %vm156_vm2, %v3855_v59, -inf  ;;  %v1857_v2 = vsel %vm156_vm2, %v1738_v61, -inf }
 0xca3   :  { %v3050_v5 = vpop.f32.mrf.mxu0  ;;  %1855 = vmax.xlane.f32.xlu0 %v1854_v63  ;;  %1858 = vmax.xlane.f32.xlu1 %v1857_v2  ;;  %v3056_v6 = vpop.f32.mrf.mxu1 }
 0xca5   :  { %v1692_v12 = vpop.f32.mrf.mxu0  ;;  %v1741_v13 = vpop.f32.mrf.mxu1 }
 0xca7   :  { %v3051_v14 = vpop.f32.mrf.mxu0  ;;  %v3057_v15 = vpop.f32.mrf.mxu1 }
 0xca9   :  { %v3860_v19 = vpop.f32.mrf.mxu0  ;;  %v1836_v20 = vpop.f32.mrf.mxu1 }
 0xcaa   :  { %v1860_v21 = vsel %vm156_vm2, %v3860_v19, -inf  ;;  %v1863_v22 = vsel %vm156_vm2, %v1836_v20, -inf }
 0xcab   :  { %v3062_v3 = vpop.f32.mrf.mxu0  ;;  %1861 = vmax.xlane.f32.xlu0 %v1860_v21  ;;  %1864 = vmax.xlane.f32.xlu1 %v1863_v22  ;;  %v3068_v23 = vpop.f32.mrf.mxu1 }
 0xcad   :  { %v1790_v32 = vpop.f32.mrf.mxu0  ;;  %v1839_v4 = vpop.f32.mrf.mxu1 }
 0xcaf   :  { %v3063_v17 = vpop.f32.mrf.mxu0  ;;  %v3069_v37 = vpop.f32.mrf.mxu1 }
 0xcb2   :  { %v1847_v26 = vpop.xlane.xlu0 %1846 }
 0xcb3   :  { %v1867_v28 = vsub.f32 %v1542_v36, %v1847_v26 }
 0xcb5   :  { %v1844_v27 = vpop.xlane.xlu1 %1843  ;;  %v1876_v31 = vmul.f32 1.442695, %v1867_v28 }
 0xcb6   :  { %v1866_v29 = vsub.f32 %v1493_v43, %v1844_v27 }
 0xcb7   :  { %3280 = vpow2.f32 %v1876_v31 }
 0xcb8   :  { %v1874_v35 = vmul.f32 1.442695, %v1866_v29 }
 0xcba   :  { %3282 = vpow2.f32 %v1874_v35 }
 0xcbc   :  { %2034 = vrot.lane.b32.xlu1 %v3777_v33, %s3400_s19 }
 0xcc1   :  { %2082 = vrot.lane.b32.xlu0 %v3775_v1, %s3400_s19 }
 0xcc4   :  { %v3281_v41 = vpop.eup %3280 }
 0xcc5   :  { %v1893_v45 = vsel %vm156_vm2, %v3281_v41, 0.0 }
 0xcc7   :  { %v3283_v42 = vpop.eup %3282 }
 0xcc8   :  { %v1890_v44 = vsel %vm156_vm2, %v3283_v42, 0.0 }
 0xce0   :  { %1891 = vadd.xlane.f32.xlu0 %v1890_v44  ;;  %1894 = vadd.xlane.f32.xlu1 %v1893_v45 }
 0xcf1   :  { %2130 = vrot.lane.b32.xlu1 %v3786_v11, %s3400_s19 }
 0xd24   :  { %v1850_v1 = vpop.xlane.xlu0 %1849  ;;  %v1853_v33 = vpop.xlane.xlu1 %1852 }
 0xd25   :  { %v1868_v48 = vsub.f32 %v1591_v52, %v1850_v1  ;;  %v1869_v36 = vsub.f32 %v1640_v24, %v1853_v33 }
 0xd27   :  { %v1878_v43 = vmul.f32 1.442695, %v1868_v48  ;;  %v1880_v38 = vmul.f32 1.442695, %v1869_v36 }
 0xd29   :  { %3284 = vpow2.f32 %v1878_v43 }
 0xd2a   :  { %3286 = vpow2.f32 %v1880_v38 }
 0xd2c   :  { %v1859_v9 = vpop.xlane.xlu1 %1858  ;;  %v1856_v63 = vpop.xlane.xlu0 %1855 }
 0xd2d   :  { %v1871_v50 = vsub.f32 %v1738_v61, %v1859_v9  ;;  %v1870_v2 = vsub.f32 %v3855_v59, %v1856_v63 }
 0xd2f   :  { %v1884_v25 = vmul.f32 1.442695, %v1871_v50  ;;  %v1882_v6 = vmul.f32 1.442695, %v1870_v2 }
 0xd31   :  { %3288 = vpow2.f32 %v1884_v25 }
 0xd34   :  { %v1865_v53 = vpop.xlane.xlu1 %1864  ;;  %v1862_v5 = vpop.xlane.xlu0 %1861 }
 0xd35   :  { %v1873_v54 = vsub.f32 %v1836_v20, %v1865_v53  ;;  %v1872_v12 = vsub.f32 %v3860_v19, %v1862_v5 }
 0xd36   :  { %v3285_v55 = vpop.eup %3284 }
 0xd37   :  { %v3287_v56 = vpop.eup %3286  ;;  %v1888_v57 = vmul.f32 1.442695, %v1873_v54  ;;  %v1896_v8 = vsel %vm156_vm2, %v3285_v55, 0.0  ;;  %v1886_v13 = vmul.f32 1.442695, %v1872_v12 }
 0xd38   :  { %1897 = vadd.xlane.f32.xlu0 %v1896_v8  ;;  %v1899_v11 = vsel %vm156_vm2, %v3287_v56, 0.0  ;;  %v2083_v14 = vpop.permute.xlu0 %2082  ;;  %v2035_v15 = vpop.permute.xlu1 %2034 }
 0xd39   :  { %1900 = vadd.xlane.f32.xlu1 %v1899_v11  ;;  %3290 = vpow2.f32 %v1888_v57  ;;  %v2040_v37 = vsel %vm647_vm3, %v2035_v15, 0  ;;  %v2088_v26 = vsel %vm647_vm3, %v2083_v14, 0 }
 0xd3a   :  { %3292 = vpow2.f32 %v1882_v6 }
 0xd3b   :  { %3294 = vpow2.f32 %v1886_v13 }
 0xd3e   :  { %v3875_v52 = vpop.eup %3288 }
 0xd3f   :  { %v1905_v24 = vsel %vm156_vm2, %v3875_v52, 0.0 }
 0xd40   :  { %1906 = vadd.xlane.f32.xlu1 %v1905_v24 }
 0xd46   :  { %v3879_v58 = vpop.eup %3290 }
 0xd47   :  { %v1911_v61 = vsel %vm156_vm2, %v3879_v58, 0.0  ;;  %v3889_v20 = vpop.eup %3292 }
 0xd48   :  { %1912 = vadd.xlane.f32.xlu1 %v1911_v61  ;;  %v3893_v59 = vpop.eup %3294 }
 0xd4e   :  { %2178 = vrot.lane.b32.xlu0 %v3784_v10, %s3400_s19  ;;  %v1902_v10 = vsel %vm156_vm2, %v3889_v20, 0.0 }
 0xd59   :  { %2226 = vrot.lane.b32.xlu1 %v3796_v18, %s3400_s19  ;;  %v1908_v18 = vsel %vm156_vm2, %v3893_v59, 0.0 }
 0xd69   :  { %v1892_v21 = vpop.xlane.xlu0 %1891  ;;  %v1895_v22 = vpop.xlane.xlu1 %1894 }
 0xd6a   :  { %3296 = vrcp.f32 %v1892_v21 }
 0xd6b   :  { %3298 = vrcp.f32 %v1895_v22 }
 0xd6d   :  { %1903 = vadd.xlane.f32.xlu0 %v1902_v10  ;;  %v2131_v27 = vpop.permute.xlu1 %2130 }
 0xd6e   :  { %v2136_v48 = vsel %vm647_vm3, %v2131_v27, 0 }
 0xd71   :  { %1909 = vadd.xlane.f32.xlu0 %v1908_v18 }
 0xd77   :  { %v3297_v19 = vpop.eup %3296 }
 0xd78   :  { %v3299_v3 = vpop.eup %3298  ;;  %v1922_v23 = vmul.f32 %v3297_v19, %v3283_v42 }
 0xd79   :  { %v1923_v32 = vmul.f32 %v3299_v3, %v3281_v41 }
 0xd7a   :  { %v1930_v4 = vpack.c.bf16 %v1922_v23, %v1922_v23 }
 0xd7b   :  { %v1931_v17 = vpack.c.bf16 %v1923_v32, %v1923_v32 }
 0xd7c   :  { %3073 = vmatmul.mubr.msk.bf16.vlgmr.msra.gmra.mxu0 %vm156_vm2, %v1930_v4 }
 0xd7d   :  { %3079 = vmatmul.mubr.msk.bf16.vlgmr.msra.gmra.mxu1 %vm156_vm2, %v1931_v17  ;;  %3083 = vmatpush3.bf16.msra.mxu0 %v2040_v37 }
 0xd7e   :  { %3089 = vmatpush3.bf16.msra.mxu1 %v2088_v26  ;;  %3084 = vmatprep.mubr.msk.bf16.mxu0 %vm3395_vm0, %v3394_v0 }
 0xd7f   :  { %3090 = vmatprep.mubr.msk.bf16.mxu1 %vm3395_vm0, %v3394_v0  ;;  %3094 = vmatprep.subr.bf16.mxu0 %v3394_v0 }
 0xd80   :  { %3100 = vmatprep.subr.bf16.mxu1 %v3394_v0 }
 0xd87   :  { %2274 = vrot.lane.b32.xlu0 %v3794_v16, %s3400_s19 }
 0xdc1   :  { %v1898_v28 = vpop.xlane.xlu0 %1897 }
 0xdc2   :  { %3300 = vrcp.f32 %v1898_v28  ;;  %v1901_v29 = vpop.xlane.xlu1 %1900  ;;  %v3232_v28 = vld [vmem:[%s4034_s2 + $0x18] sm:$0xff]  }
 0xdc3   :  { %3302 = vrcp.f32 %v1901_v29 }
 0xdc5   :  { %v2179_v45 = vpop.permute.xlu0 %2178 }
 0xdc6   :  { %v2184_v16 = vsel %vm647_vm3, %v2179_v45, 0 }
 0xdc9   :  { %v1907_v31 = vpop.xlane.xlu1 %1906 }
 0xdca   :  { %3304 = vrcp.f32 %v1907_v31 }
 0xdcf   :  { %v3301_v35 = vpop.eup %3300 }
 0xdd0   :  { %v3303_v41 = vpop.eup %3302  ;;  %v1924_v42 = vmul.f32 %v3301_v35, %v3285_v55 }
 0xdd1   :  { %v1925_v44 = vmul.f32 %v3303_v41, %v3287_v56  ;;  %v1913_v9 = vpop.xlane.xlu1 %1912 }
 0xdd2   :  { %v1932_v1 = vpack.c.bf16 %v1924_v42, %v1924_v42  ;;  %3306 = vrcp.f32 %v1913_v9 }
 0xdd3   :  { %v1933_v33 = vpack.c.bf16 %v1925_v44, %v1925_v44  ;;  %v3233_v44 = vld [vmem:[%s4034_s2 + $0x10] sm:$0xff]  }
 0xdd4   :  { %3085 = vmatmul.mubr.msk.bf16.vlgmr.msra.gmra.mxu0 %vm156_vm2, %v1932_v1 }
 0xdd5   :  { %3091 = vmatmul.mubr.msk.bf16.vlgmr.msra.gmra.mxu1 %vm156_vm2, %v1933_v33  ;;  %3095 = vmatpush3.bf16.msra.mxu0 %v2136_v48 }
 0xdd6   :  { %3101 = vmatpush3.bf16.msra.mxu1 %v2184_v16  ;;  %3102 = vmatprep.mubr.msk.bf16.mxu1 %vm3395_vm0, %v3394_v0 }
 0xdd7   :  { %3112 = vmatprep.subr.bf16.mxu1 %v3394_v0  ;;  %3096 = vmatprep.mubr.msk.bf16.mxu0 %vm3395_vm0, %v3394_v0  ;;  %v3305_v36 = vpop.eup %3304 }
 0xdd8   :  { %3106 = vmatprep.subr.bf16.mxu0 %v3394_v0  ;;  %v1927_v43 = vmul.f32 %v3305_v36, %v3875_v52  ;;  %v2227_v52 = vpop.permute.xlu1 %2226 }
 0xdda   :  { %v1935_v38 = vpack.c.bf16 %v1927_v43, %v1927_v43 }
 0xddd   :  { %3103 = vmatmul.mubr.msk.bf16.vlgmr.msra.gmra.mxu1 %vm156_vm2, %v1935_v38 }
 0xdde   :  { %3114 = vmatprep.mubr.msk.bf16.mxu1 %vm3395_vm0, %v3394_v0 }
 0xddf   :  { %v3307_v25 = vpop.eup %3306 }
 0xde0   :  { %v1929_v54 = vmul.f32 %v3307_v25, %v3879_v58  ;;  %v2232_v58 = vsel %vm647_vm3, %v2227_v52, 0 }
 0xde2   :  { %v1937_v57 = vpack.c.bf16 %v1929_v54, %v1929_v54 }
 0xdf6   :  { %v1904_v50 = vpop.xlane.xlu0 %1903 }
 0xdf7   :  { %3308 = vrcp.f32 %v1904_v50 }
 0xdfa   :  { %v1910_v53 = vpop.xlane.xlu0 %1909 }
 0xdfb   :  { %3310 = vrcp.f32 %v1910_v53 }
 0xdfe   :  { %v2275_v55 = vpop.permute.xlu0 %2274 }
 0xdff   :  { %v2280_v56 = vsel %vm647_vm3, %v2275_v55, 0 }
 0xe00   :  { %3113 = vmatpush3.bf16.msra.mxu1 %v2280_v56 }
 0xe01   :  { %3126 = vmatprep.subr.bf16.mxu1 %v3394_v0 }
 0xe03   :  { %3115 = vmatmul.mubr.msk.bf16.vlgmr.msra.gmra.mxu1 %vm156_vm2, %v1937_v57 }
 0xe04   :  { %v3309_v8 = vpop.eup %3308  ;;  %3130 = vmatprep.mubr.msk.bf16.mxu1 %vm3395_vm0, %v3394_v0 }
 0xe05   :  { %v1926_v11 = vmul.f32 %v3309_v8, %v3889_v20 }
 0xe07   :  { %v1934_v24 = vpack.c.bf16 %v1926_v11, %v1926_v11 }
 0xe08   :  { %v3311_v61 = vpop.eup %3310 }
 0xe09   :  { %3097 = vmatmul.mubr.msk.bf16.vlgmr.msra.gmra.mxu0 %vm156_vm2, %v1934_v24  ;;  %v1928_v63 = vmul.f32 %v3311_v61, %v3893_v59 }
 0xe0a   :  { %3107 = vmatpush3.bf16.msra.mxu0 %v2232_v58  ;;  %3108 = vmatprep.mubr.msk.bf16.mxu0 %vm3395_vm0, %v3394_v0 }
 0xe0b   :  { %3118 = vmatprep.subr.bf16.mxu0 %v3394_v0  ;;  %v1936_v2 = vpack.c.bf16 %v1928_v63, %v1928_v63 }
 0xe11   :  { %3109 = vmatmul.mubr.msk.bf16.vlgmr.msra.gmra.mxu0 %vm156_vm2, %v1936_v2 }
 0xe12   :  { %3122 = vmatprep.mubr.msk.bf16.mxu0 %vm3395_vm0, %v3394_v0  ;;  %3119 = vmatpush3.bf16.msra.mxu0 %v3232_v28  ;;  %v3236_v28 = vld [vmem:[%s4036_s4 + $0x38] sm:$0xff]  }
 0xe13   :  { %3120 = vmatprep.subr.bf16.mxu0 %v3394_v0 }
 0xe16   :  { %3121 = vmatpush3.bf16.msra.mxu0 %v3233_v44 }
 0xe17   :  { %3134 = vmatprep.subr.bf16.mxu0 %v3394_v0 }
 0xe3c   :  { %v1980_v5 = vpop.f32.mrf.mxu0 }
 0xe3d   :  { %v2028_v6 = vpop.f32.mrf.mxu1 }
 0xe3e   :  { %v3074_v12 = vpop.f32.mrf.mxu0 }
 0xe3f   :  { %v3080_v13 = vpop.f32.mrf.mxu1 }
 0xe40   :  { %v1983_v14 = vpop.f32.mrf.mxu0 }
 0xe41   :  { %v2031_v15 = vpop.f32.mrf.mxu1 }
 0xe42   :  { %v3075_v20 = vpop.f32.mrf.mxu0 }
 0xe43   :  { %v3081_v21 = vpop.f32.mrf.mxu1 }
 0xe94   :  { %v2076_v22 = vpop.f32.mrf.mxu0 }
 0xe95   :  { %v2124_v10 = vpop.f32.mrf.mxu1 }
 0xe96   :  { %v3205_v18 = vpack.i.bf16 %v2124_v10, %v2076_v22  ;;  %v3086_v59 = vpop.f32.mrf.mxu0 }
 0xe97   :  { %v3092_v19 = vpop.f32.mrf.mxu1 }
 0xe98   :  { %3206 = vrot.lane.b32.xlu1 %v3205_v18, %s3392_s28  ;;  %v2079_v3 = vpop.f32.mrf.mxu0 }
 0xe99   :  { %v2127_v23 = vpop.f32.mrf.mxu1 }
 0xe9a   :  { %v3087_v32 = vpop.f32.mrf.mxu0 }
 0xe9b   :  { %v3093_v4 = vpop.f32.mrf.mxu1 }
 0xe9d   :  { %v2220_v17 = vpop.f32.mrf.mxu1 }
 0xe9f   :  { %v3104_v37 = vpop.f32.mrf.mxu1 }
 0xea1   :  { %v2223_v26 = vpop.f32.mrf.mxu1 }
 0xea3   :  { %v3105_v27 = vpop.f32.mrf.mxu1 }
 0xea4   :  { %v3235_v27 = vld [vmem:[%s4035_s3 + $0x10] sm:$0xff]  }
 0xec3   :  { %v2316_v29 = vpop.f32.mrf.mxu1 }
 0xec5   :  { %v3116_v31 = vpop.f32.mrf.mxu1 }
 0xec7   :  { %v2319_v35 = vpop.f32.mrf.mxu1 }
 0xec9   :  { %v2172_v41 = vpop.f32.mrf.mxu0  ;;  %v3117_v42 = vpop.f32.mrf.mxu1 }
 0xeca   :  { %v3210_v45 = vpack.i.bf16 %v2220_v17, %v2172_v41 }
 0xecb   :  { %v3098_v1 = vpop.f32.mrf.mxu0 }
 0xecc   :  { %3211 = vrot.lane.b32.xlu0 %v3210_v45, %s3401_s24 }
 0xecd   :  { %v2175_v33 = vpop.f32.mrf.mxu0 }
 0xece   :  { %v2449_v33 = vrot.slane %v3765_v49, %v1155_v34  ;;  %v3238_v34 = vld [vmem:[%s4036_s4 + $0x28] sm:$0xff]  }
 0xecf   :  { %v3099_v48 = vpop.f32.mrf.mxu0 }
 0xed1   :  { %v2268_v16 = vpop.f32.mrf.mxu0 }
 0xed2   :  { %v3215_v36 = vpack.i.bf16 %v2316_v29, %v2268_v16 }
 0xed3   :  { %v3110_v43 = vpop.f32.mrf.mxu0 }
 0xed4   :  { %3216 = vrot.lane.b32.xlu1 %v3215_v36, %s3402_s25  ;;  %v2455_v43 = vrot.slane %v3765_v49, %v1161_v40  ;;  %v3239_v40 = vld [vmem:[%s4036_s4 + $0x20] sm:$0xff]  }
 0xed5   :  { %v2271_v38 = vpop.f32.mrf.mxu0 }
 0xed7   :  { %v3111_v9 = vpop.f32.mrf.mxu0 }
 0xf0a   :  { %v3207_v50 = vpop.permute.xlu1 %3206 }
 0xf0b   :  { %v3209_v53 = vunpack.i.h.bf16 %v3207_v50  ;;  %v3208_v54 = vunpack.i.l.bf16 %v3207_v50 }
 0xf0d   :  { %v2347_v8 = vsel %vm156_vm2, %v2028_v6, %v3209_v53  ;;  %v2346_v11 = vsel %vm156_vm2, %v1980_v5, %v3208_v54  ;;  %v2361_v5 = vrot.slane %v3765_v49, %v1066_v62  ;;  %v3237_v53 = vld [vmem:[%s4036_s4 + $0x30] sm:$0xff]   ;;  %v2467_v54 = vrot.slane %v3765_v49, %v1172_v51 }
 0xf3e   :  { %v3212_v25 = vpop.permute.xlu0 %3211 }
 0xf3f   :  { %v3214_v55 = vunpack.i.h.bf16 %v3212_v25  ;;  %v3213_v56 = vunpack.i.l.bf16 %v3212_v25 }
 0xf41   :  { %v2349_v61 = vsel %vm1053_vm4, %v2347_v8, %v3214_v55  ;;  %v2348_v58 = vsel %vm1053_vm4, %v2346_v11, %v3213_v56 }
 0xf46   :  { %v3217_v57 = vpop.permute.xlu1 %3216 }
 0xf47   :  { %v3219_v52 = vunpack.i.h.bf16 %v3217_v57  ;;  %v3218_v24 = vunpack.i.l.bf16 %v3217_v57 }
 0xf49   :  { %v2351_v63 = vsel %vm1056_vm5, %v2349_v61, %v3219_v52  ;;  %v2350_v2 = vsel %vm1056_vm5, %v2348_v58, %v3218_v24 }
 0xf4a   :  { %v2352_v12 = vpack.c.bf16 %v2351_v63, %v2350_v2 }
 0xf4c   :  { %3123 = vmatmul.mubr.msk.bf16.vlgmr.msra.gmra.mxu0 %vm80_vm1, %v2352_v12 }
 0xf4d   :  { %3142 = vmatprep.mubr.msk.bf16.mxu0 %vm3395_vm0, %v3394_v0  ;;  %3135 = vmatpush3.bf16.msra.mxu0 %v3236_v28 }
 0xf4e   :  { %3136 = vmatprep.subr.bf16.mxu0 %v3394_v0 }
 0xf51   :  { %3137 = vmatpush3.bf16.msra.mxu0 %v3237_v53 }
 0xf52   :  { %3138 = vmatprep.subr.bf16.mxu0 %v3394_v0 }
 0xf55   :  { %3139 = vmatpush3.bf16.msra.mxu0 %v3238_v34 }
 0xf56   :  { %3140 = vmatprep.subr.bf16.mxu0 %v3394_v0 }
 0xf59   :  { %3141 = vmatpush3.bf16.msra.mxu0 %v3239_v40 }
0x100c   :  { %v2411_v6 = vpop.f32.mrf.mxu0 }
0x100d   :  { %v2412_v13 = vadd.f32 %v2411_v6, %v2361_v5 }
0x100e   :  { %v3124_v14 = vpop.f32.mrf.mxu0 }
0x100f   :  { %v2418_v15 = vadd.f32 %v2412_v13, %v3756_v46 }
0x1010   :  { %v2414_v20 = vpop.f32.mrf.mxu0 }
0x1011   :  { %v2415_v21 = vadd.f32 %v2414_v20, %v2361_v5  ;;  %v2420_v22 = vsel %vm80_vm1, %v2418_v15, 0.0 }
0x1012   :  { %2421 = vadd.xlane.f32.xlu0 %v2420_v22  ;;  %v3125_v10 = vpop.f32.mrf.mxu0 }
0x1013   :  { %v2419_v18 = vadd.f32 %v2415_v21, %v3758_v47  ;;  %v3234_v47 = vld [vmem:[%s4035_s3 + $0x18] sm:$0xff]  }
0x1014   :  { %3127 = vmatpush3.bf16.msra.mxu1 %v3234_v47  ;;  %v2639_v47 = vrot.slane %v3765_v49, %v1344_v30 }
0x1015   :  { %v2423_v59 = vsel %vm80_vm1, %v2419_v18, 0.0  ;;  %3128 = vmatprep.subr.bf16.mxu1 %v3394_v0  ;;  %v2539_v0 = vrot.slane %v3765_v49, %v1243_v60 }
0x1016   :  { %2424 = vadd.xlane.f32.xlu1 %v2423_v59 }
0x1018   :  { %3129 = vmatpush3.bf16.msra.mxu1 %v3235_v27 }
0x109b   :  { %v2422_v19 = vpop.xlane.xlu0 %2421 }
0x109c   :  { %v2426_v3 = vmul.f32 0.03125, %v2422_v19 }
0x109e   :  { %v2428_v23 = vsub.f32 %v2418_v15, %v2426_v3 }
0x109f   :  { %v2425_v62 = vpop.xlane.xlu1 %2424 }
0x10a0   :  { %v2427_v32 = vmul.f32 0.03125, %v2425_v62  ;;  %v2430_v4 = vmul.f32 %v2428_v23, %v2428_v23 }
0x10a2   :  { %v2429_v17 = vsub.f32 %v2419_v18, %v2427_v32  ;;  %v2432_v46 = vsel %vm80_vm1, %v2430_v4, 0.0 }
0x10a3   :  { %2433 = vadd.xlane.f32.xlu0 %v2432_v46 }
0x10a4   :  { %v2431_v37 = vmul.f32 %v2429_v17, %v2429_v17 }
0x10a6   :  { %v2435_v26 = vsel %vm80_vm1, %v2431_v37, 0.0 }
0x10a7   :  { %2436 = vadd.xlane.f32.xlu0 %v2435_v26 }
0x112c   :  { %v2434_v29 = vpop.xlane.xlu0 %2433 }
0x112d   :  { %v2438_v31 = vmul.f32 0.03125, %v2434_v29  ;;  %v2645_v29 = vrot.slane %v3765_v49, %v1350_v39 }
0x112f   :  { %v2440_v35 = vadd.f32 1e-05, %v2438_v31 }
0x1130   :  { %v2437_v41 = vpop.xlane.xlu0 %2436 }
0x1131   :  { %3312 = vrsqrt.f32 %v2440_v35  ;;  %v2439_v42 = vmul.f32 0.03125, %v2437_v41 }
0x1133   :  { %v2441_v44 = vadd.f32 1e-05, %v2439_v42 }
0x1135   :  { %3314 = vrsqrt.f32 %v2441_v44 }
0x113e   :  { %v3313_v45 = vpop.eup %3312 }
0x113f   :  { %v2444_v1 = vmul.f32 %v3313_v45, %v2428_v23 }
0x1141   :  { %v2450_v36 = vmul.f32 %v2449_v33, %v2444_v1 }
0x1142   :  { %v3315_v48 = vpop.eup %3314 }
0x1143   :  { %v2445_v16 = vmul.f32 %v3315_v48, %v2429_v17  ;;  %v2456_v9 = vadd.f32 %v2455_v43, %v2450_v36 }
0x1145   :  { %v2451_v38 = vmul.f32 %v2449_v33, %v2445_v16 }
0x1147   :  { %v2457_v50 = vadd.f32 %v2455_v43, %v2451_v38 }
0x1149   :  { %v2458_v25 = vpack.c.bf16 %v2457_v50, %v2456_v9 }
0x114b   :  { %3131 = vmatmul.mubr.msk.bf16.vlgmr.msra.gmra.mxu1 %vm80_vm1, %v2458_v25 }
0x120b   :  { %v2517_v55 = vpop.f32.mrf.mxu1 }
0x120c   :  { %v2518_v57 = vadd.f32 %v2517_v55, %v2467_v54 }
0x120d   :  { %v3132_v56 = vpop.f32.mrf.mxu1 }
0x120e   :  { %v2524_v24 = vmax.f32 %v2518_v57, 0.0  ;;  %v2788_v56 = vld [vmem:[%s4038_s6] ss:$0 sm:$0xff] }
0x120f   :  { %v2520_v8 = vpop.f32.mrf.mxu1 }
0x1210   :  { %v2521_v11 = vadd.f32 %v2520_v8, %v2467_v54  ;;  %v2789_v8 = vld [vmem:[%s4038_s6 + $0x1] ss:$0 sm:$0xff] }
0x1211   :  { %v3133_v52 = vpop.f32.mrf.mxu1 }
0x1212   :  { %v2525_v61 = vmax.f32 %v2521_v11, 0.0 }
0x1214   :  { %v2526_v58 = vpack.c.bf16 %v2525_v61, %v2524_v24 }
0x1216   :  { %3143 = vmatmul.mubr.msk.bf16.vlgmr.msra.gmra.mxu0 %vm1269_vm6, %v2526_v58 }
0x12d6   :  { %v2601_v63 = vpop.f32.mrf.mxu0 }
0x12d7   :  { %v2602_v2 = vadd.f32 %v2601_v63, %v2539_v0 }
0x12d8   :  { %v3144_v12 = vpop.f32.mrf.mxu0 }
0x12d9   :  { %v2608_v5 = vadd.f32 %v2602_v2, %v2456_v9 }
0x12da   :  { %v2604_v51 = vpop.f32.mrf.mxu0 }
0x12db   :  { %v2605_v6 = vadd.f32 %v2604_v51, %v2539_v0  ;;  %v2610_v13 = vsel %vm80_vm1, %v2608_v5, 0.0 }
0x12dc   :  { %2611 = vadd.xlane.f32.xlu1 %v2610_v13  ;;  %v3145_v14 = vpop.f32.mrf.mxu0 }
0x12dd   :  { %v2609_v15 = vadd.f32 %v2605_v6, %v2457_v50 }
0x12df   :  { %v2613_v20 = vsel %vm80_vm1, %v2609_v15, 0.0 }
0x12e0   :  { %2614 = vadd.xlane.f32.xlu0 %v2613_v20 }
0x1365   :  { %v2612_v21 = vpop.xlane.xlu1 %2611 }
0x1366   :  { %v2616_v22 = vmul.f32 0.03125, %v2612_v21 }
0x1368   :  { %v2618_v10 = vsub.f32 %v2608_v5, %v2616_v22 }
0x1369   :  { %v2615_v18 = vpop.xlane.xlu0 %2614 }
0x136a   :  { %v2617_v59 = vmul.f32 0.03125, %v2615_v18  ;;  %v2620_v60 = vmul.f32 %v2618_v10, %v2618_v10 }
0x136c   :  { %v2619_v19 = vsub.f32 %v2609_v15, %v2617_v59  ;;  %v2622_v3 = vsel %vm80_vm1, %v2620_v60, 0.0 }
0x136d   :  { %2623 = vadd.xlane.f32.xlu1 %v2622_v3 }
0x136e   :  { %v2621_v23 = vmul.f32 %v2619_v19, %v2619_v19 }
0x1370   :  { %v2625_v62 = vsel %vm80_vm1, %v2621_v23, 0.0 }
0x1371   :  { %2626 = vadd.xlane.f32.xlu0 %v2625_v62 }
0x13f6   :  { %v2624_v32 = vpop.xlane.xlu1 %2623 }
0x13f7   :  { %v2628_v4 = vmul.f32 0.03125, %v2624_v32 }
0x13f9   :  { %v2630_v17 = vadd.f32 1e-05, %v2628_v4 }
0x13fa   :  { %v2627_v46 = vpop.xlane.xlu0 %2626 }
0x13fb   :  { %3316 = vrsqrt.f32 %v2630_v17  ;;  %v2629_v37 = vmul.f32 0.03125, %v2627_v46 }
0x13fd   :  { %v2631_v26 = vadd.f32 1e-05, %v2629_v37 }
0x13ff   :  { %3318 = vrsqrt.f32 %v2631_v26 }
0x1408   :  { %v3317_v27 = vpop.eup %3316 }
0x1409   :  { %v2634_v28 = vmul.f32 %v3317_v27, %v2618_v10 }
0x140b   :  { %v2640_v31 = vmul.f32 %v2639_v47, %v2634_v28 }
0x140c   :  { %v3319_v35 = vpop.eup %3318 }
0x140d   :  { %v2646_v41 = vadd.f32 %v2645_v29, %v2640_v31  ;;  %v2635_v42 = vmul.f32 %v3319_v35, %v2619_v19 }
0x140f   :  { %v2650_v44 = vsel %vm80_vm1, %v2646_v41, 0.0  ;;  %v2641_v45 = vmul.f32 %v2639_v47, %v2635_v42 }
0x1410   :  { %2651 = vadd.xlane.f32.xlu1 %v2650_v44 }
0x1411   :  { %v2647_v1 = vadd.f32 %v2645_v29, %v2641_v45 }
0x1413   :  { %v2653_v33 = vsel %vm80_vm1, %v2647_v1, 0.0 }
0x1414   :  { %2654 = vadd.xlane.f32.xlu0 %v2653_v33 }
0x1499   :  { %v2652_v48 = vpop.xlane.xlu1 %2651 }
0x149a   :  { %v2656_v30 = vmul.f32 0.03125, %v2652_v48 }
0x149c   :  { %v2658_v16 = vsub.f32 %v2646_v41, %v2656_v30 }
0x149d   :  { %v2655_v36 = vpop.xlane.xlu0 %2654 }
0x149e   :  { %v2657_v43 = vmul.f32 0.03125, %v2655_v36  ;;  %v2660_v7 = vmul.f32 %v2658_v16, %v2658_v16 }
0x14a0   :  { %v2659_v38 = vsub.f32 %v2647_v1, %v2657_v43  ;;  %v2662_v39 = vsel %vm80_vm1, %v2660_v7, 0.0 }
0x14a1   :  { %2663 = vadd.xlane.f32.xlu1 %v2662_v39 }
0x14a2   :  { %v2661_v49 = vmul.f32 %v2659_v38, %v2659_v38 }
0x14a4   :  { %v2665_v9 = vsel %vm80_vm1, %v2661_v49, 0.0 }
0x14a5   :  { %2666 = vadd.xlane.f32.xlu0 %v2665_v9 }
0x152a   :  { %v2664_v50 = vpop.xlane.xlu1 %2663 }
0x152b   :  { %v2668_v25 = vmul.f32 0.03125, %v2664_v50 }
0x152d   :  { %v2670_v53 = vadd.f32 1e-05, %v2668_v25 }
0x152e   :  { %v2667_v34 = vpop.xlane.xlu0 %2666 }
0x152f   :  { %3320 = vrsqrt.f32 %v2670_v53  ;;  %v2669_v40 = vmul.f32 0.03125, %v2667_v34 }
0x1531   :  { %v2671_v54 = vadd.f32 1e-05, %v2669_v40 }
0x1533   :  { %3322 = vrsqrt.f32 %v2671_v54 }
0x153c   :  { %v3321_v55 = vpop.eup %3320 }
0x153d   :  { %v2674_v57 = vmul.f32 %v3321_v55, %v2658_v16 }
0x153f   :  { %v2680_v11 = vmul.f32 %v2788_v56, %v2674_v57 }
0x1540   :  { %v3323_v52 = vpop.eup %3322 }
0x1541   :  { %v2675_v24 = vmul.f32 %v3323_v52, %v2659_v38  ;;  %v2686_v61 = vadd.f32 %v2789_v8, %v2680_v11 }
0x1543   :  { %v2681_v58 = vmul.f32 %v2788_v56, %v2675_v24  ;;  %2688 = vst.msk [vmem:[#allocation7] sm:$0xff] %vm80_vm1, %v2686_v61 }
0x1545   :  { %v2687_v0 = vadd.f32 %v2789_v8, %v2681_v58 }
0x1547   :  { %2689 = vst.msk [vmem:[#allocation7 + $0x8] sm:$0xff] %vm80_vm1, %v2687_v0 }
0x1548   :  { %3375 = shalt.err (!%p3372_p0)
}
0x1549   :  { %2701 = dma.vmem_to_hbm [thread:$0]  %s2696_s5, 256, %s4039_s7, [#allocation4], %s3391_s27, %s3391_s27, %s3392_s28  }
0x154a   :  { %3388 = dma.done.wait [#allocation4], 256  }
0x154b   :  { %3389 = vsyncadd [#allocation4], 4294967040 }
0x154c   :  { %2705 = vsyncpa [#allocation3], 1 }
0x154d   :  { %2706 = vsyncpa [#allocation6], 1 }
0x154e   :  { %2707 = vsyncpa [#allocation4], 1 }

</bundles_post_ra>
